<compile_context>
chip_gen: v6e
topology: v6e:2x2x1
jax: 0.10.0
libtpu: 0.0.40
codegen_flags: <defaults>
</compile_context>

<pallas_src>
import jax
import jax.numpy as jnp
from jax import lax
from jax.experimental import pallas as pl
from jax.experimental.pallas import tpu as pltpu


def _lstm_kernel(embed_ref, wcomb_ref, bcomb_ref, wcat_ref, bgate_ref,
                 wfc_ref, bfc_ref, out_ref, h_scr, c_scr):
    TC, B, Dc = embed_ref.shape
    H = wcomb_ref.shape[1]
    L = wcat_ref.shape[0]
    H4 = 4 * H

    # ---- init_hidden: zeros, only on the first time-chunk ----
    @pl.when(pl.program_id(0) == 0)
    def _init():
        h_scr[...] = jnp.zeros_like(h_scr)
        c_scr[...] = jnp.zeros_like(c_scr)

    # ---- weights/biases hoisted out of the unrolled chunk body ----
    wcomb = wcomb_ref[...]                       # (Dc, H)
    bcomb = bcomb_ref[...]                       # (1, H)
    wfc = wfc_ref[...]                           # (1, H)
    bfc = bfc_ref[...]                           # (1, 1)
    w_l = [wcat_ref[l] for l in range(L)]        # each (2H, 4H)  [x-rows | h-rows]
    b_l = [bgate_ref[l] for l in range(L)]       # each (1, 4H)   b_ih + b_hh
    # TODO(synk): for L >= 4 read w_l[l] inside the layer loop instead of
    # hoisting every tile (vreg pressure / spills).

    lane = lax.broadcasted_iota(jnp.int32, (1, H4), 1)
    g_mask = (lane >= 2 * H) & (lane < 3 * H)    # PyTorch gate order i, f, g, o
    scale = jnp.where(g_mask, 1.0, 0.5).astype(jnp.float32)

    def cell(gates, c_prev):
        # one EUP push: sigmoid(x) = 0.5*(tanh(x/2)+1); tanh on the g-gate lanes
        t = jnp.tanh(gates * scale)
        act = jnp.where(g_mask, t, 0.5 * t + 0.5)
        i_g = act[:, 0 * H:1 * H]
        f_g = act[:, 1 * H:2 * H]
        g_g = act[:, 2 * H:3 * H]
        o_g = act[:, 3 * H:4 * H]
        c_new = f_g * c_prev + i_g * g_g
        h_new = o_g * jnp.tanh(c_new)
        return h_new, c_new

    # recurrent state in registers for the whole chunk (one VMEM read here)
    h = [h_scr[l] for l in range(L)]
    c = [c_scr[l] for l in range(L)]

    t_lane = lax.broadcasted_iota(jnp.int32, (1, TC), 1)
    out_tile = jnp.zeros((B, TC), jnp.float32)

    for tl in range(TC):                         # chunk unrolled (grid bounds it)
        # comb_proj for this step -- independent of the recurrent chain
        x = jnp.dot(embed_ref[tl], wcomb,
                    preferred_element_type=jnp.float32) + bcomb      # (B, H)
        inp = x
        for l in range(L):
            # fused LHS built in registers (no stage_scr store/reload)
            lhs = jnp.concatenate([inp, h[l]], axis=-1)              # (B, 2H)
            gates = jnp.dot(lhs, w_l[l],
                            preferred_element_type=jnp.float32) + b_l[l]
            h[l], c[l] = cell(gates, c[l])
            inp = h[l]
        # fc + sigmoid folded into the loop: VPU mul + lane reduce (no hseq scratch)
        logit = jnp.sum(inp * wfc, axis=-1, keepdims=True) + bfc     # (B, 1)
        pred = jax.nn.sigmoid(logit)
        out_tile = out_tile + jnp.where(t_lane == tl, pred, 0.0)

    out_ref[...] = out_tile                      # single lane-dense (B, tc) store

    # persist state once per chunk for the next grid iteration
    for l in range(L):
        h_scr[l] = h[l]
        c_scr[l] = c[l]


def lstm_forward_pallas(embed_tbd, params, *, B, T, H, L, tc=None):
    """embed_tbd: (T, B, Dcat) float32 (time-major). Returns preds (B, T)."""
    (w_comb, b_comb, w_ih, w_hh, b_ih, b_hh, w_fc, b_fc) = params
    Dc = embed_tbd.shape[-1]

    if tc is None:
        # output block's lane dim must be a multiple of 128 or the full T
        tc = 128 if (T % 128 == 0) else T
    assert T % tc == 0, "T must be divisible by the time-chunk size"
    n_chunks = T // tc

    # parameter-only layout prep (tiny, once per call)
    w_cat = jnp.concatenate([w_ih, w_hh], axis=1)      # (L, 2H, 4H)
    b_gate = b_ih + b_hh                               # (L, 1, 4H)
    wfc_row = jnp.reshape(w_fc.T, (1, H))              # (1, H)

    out = pl.pallas_call(
        _lstm_kernel,
        out_shape=jax.ShapeDtypeStruct((B, T), jnp.float32),
        grid=(n_chunks,),
        in_specs=[
            pl.BlockSpec((tc, B, Dc), lambda ci: (ci, 0, 0)),   # stream embeddings
            pl.BlockSpec((Dc, H), lambda ci: (0, 0)),           # w_comb (resident)
            pl.BlockSpec((1, H), lambda ci: (0, 0)),            # b_comb
            pl.BlockSpec((L, 2 * H, 4 * H), lambda ci: (0, 0, 0)),  # fused W
            pl.BlockSpec((L, 1, 4 * H), lambda ci: (0, 0, 0)),  # fused biases
            pl.BlockSpec((1, H), lambda ci: (0, 0)),            # fc weight row
            pl.BlockSpec((1, 1), lambda ci: (0, 0)),            # fc bias
        ],
        out_specs=pl.BlockSpec((B, tc), lambda ci: (0, ci)),
        scratch_shapes=[
            pltpu.VMEM((L, B, H), jnp.float32),   # h state (persists across chunks)
            pltpu.VMEM((L, B, H), jnp.float32),   # c state
        ],
        compiler_params=pltpu.CompilerParams(
            dimension_semantics=("arbitrary",)),  # serial time recurrence
    )(embed_tbd, w_comb, b_comb, w_cat, b_gate, wfc_row, b_fc)
    return out                                    # already (B, T), lane-dense


def ref_forward(embed_btd, w_comb, b_comb, w_ih, w_hh, b_ih, b_hh, w_fc, b_fc,
                *, B, T, H, L):
    """Pure-JAX reference of the same math (for numeric sanity)."""
    X = embed_btd @ w_comb + b_comb[0]          # (B, T, H)
    h = jnp.zeros((L, B, H), jnp.float32)
    c = jnp.zeros((L, B, H), jnp.float32)
    outs = []
    for t in range(T):
        inp = X[:, t, :]
        for l in range(L):
            gates = inp @ w_ih[l] + h[l] @ w_hh[l] + b_ih[l, 0] + b_hh[l, 0]
            i_g = jax.nn.sigmoid(gates[:, 0 * H:1 * H])
            f_g = jax.nn.sigmoid(gates[:, 1 * H:2 * H])
            g_g = jnp.tanh(gates[:, 2 * H:3 * H])
            o_g = jax.nn.sigmoid(gates[:, 3 * H:4 * H])
            c = c.at[l].set(f_g * c[l] + i_g * g_g)
            h = h.at[l].set(o_g * jnp.tanh(c[l]))
            inp = h[l]
        outs.append(inp)
    seq = jnp.stack(outs, axis=1)               # (B, T, H)
    logits = seq @ w_fc + b_fc[0]               # (B, T, 1)
    return jax.nn.sigmoid(logits).reshape(B, T)


if __name__ == "__main__":
    # ---- model hyperparameters (mirrors args) ----
    H = 32            # hidden_dim
    L = 2             # n_layers
    B = 2             # batch
    T = 8             # sequence length
    n_test, n_questions, n_tag = 10, 20, 5
    Hd = H // 3       # per-embedding dim = 10
    Dc = Hd * 4       # concat dim = 40

    key = jax.random.PRNGKey(0)
    ks = jax.random.split(key, 20)

    # ---- deterministic parameter init (synthetic; not a checkpoint load) ----
    emb_interaction = jax.random.normal(ks[0], (3, Hd), jnp.float32) * 0.1
    emb_test = jax.random.normal(ks[1], (n_test + 1, Hd), jnp.float32) * 0.1
    emb_question = jax.random.normal(ks[2], (n_questions + 1, Hd), jnp.float32) * 0.1
    emb_tag = jax.random.normal(ks[3], (n_tag + 1, Hd), jnp.float32) * 0.1

    # comb_proj (stored pre-transposed as (in, out)); biases kept 2-D for TPU
    w_comb = jax.random.normal(ks[4], (Dc, H), jnp.float32) * 0.1
    b_comb = jax.random.normal(ks[5], (1, H), jnp.float32) * 0.1

    # LSTM weights: every layer has input size H (comb_proj output / prev layer)
    # stored pre-transposed as (input, 4H); gate order i,f,g,o like PyTorch.
    w_ih = jax.random.normal(ks[6], (L, H, 4 * H), jnp.float32) * 0.1
    w_hh = jax.random.normal(ks[7], (L, H, 4 * H), jnp.float32) * 0.1
    b_ih = jax.random.normal(ks[8], (L, 1, 4 * H), jnp.float32) * 0.1
    b_hh = jax.random.normal(ks[9], (L, 1, 4 * H), jnp.float32) * 0.1

    w_fc = jax.random.normal(ks[10], (H, 1), jnp.float32) * 0.1
    b_fc = jax.random.normal(ks[11], (1, 1), jnp.float32) * 0.1

    # ---- deterministic inputs (test, question, tag, _, mask, interaction, _) ----
    test = jax.random.randint(ks[12], (B, T), 0, n_test + 1)
    question = jax.random.randint(ks[13], (B, T), 0, n_questions + 1)
    tag = jax.random.randint(ks[14], (B, T), 0, n_tag + 1)
    interaction = jax.random.randint(ks[15], (B, T), 0, 3)
    mask = jnp.ones((B, T), jnp.float32)        # unused by the forward pass

    # ---- embedding gathers + concat (glue, plain JAX) ----
    embed_btd = jnp.concatenate(
        [emb_interaction[interaction], emb_test[test],
         emb_question[question], emb_tag[tag]], axis=2)          # (B, T, Dc)
    embed_tbd = jnp.transpose(embed_btd, (1, 0, 2))              # (T, B, Dc)

    params = (w_comb, b_comb, w_ih, w_hh, b_ih, b_hh, w_fc, b_fc)

    preds = lstm_forward_pallas(embed_tbd, params, B=B, T=T, H=H, L=L)
    preds = jax.block_until_ready(preds)

    ref = ref_forward(embed_btd, *params, B=B, T=T, H=H, L=L)
    assert preds.shape == (B, T)
    assert jnp.allclose(preds, ref, rtol=1e-4, atol=1e-5), "mismatch vs reference"

    print("KERNEL_OK")
</pallas_src>

<mosaic_0001>
module attributes {stable_mosaic.version = 11 : i64} {
  func.func @_lstm_kernel(%arg0: i32, %arg1: memref<8x2x40xf32, #tpu.memory_space<vmem>>, %arg2: memref<40x32xf32, #tpu.memory_space<vmem>>, %arg3: memref<1x32xf32, #tpu.memory_space<vmem>>, %arg4: memref<2x64x128xf32, #tpu.memory_space<vmem>>, %arg5: memref<2x1x128xf32, #tpu.memory_space<vmem>>, %arg6: memref<1x32xf32, #tpu.memory_space<vmem>>, %arg7: memref<1x1xf32, #tpu.memory_space<vmem>>, %arg8: memref<2x8xf32, #tpu.memory_space<vmem>>, %arg9: memref<2x2x32xf32, #tpu.memory_space<vmem>>, %arg10: memref<2x2x32xf32, #tpu.memory_space<vmem>>) attributes {dimension_semantics = [#tpu.dimension_semantics<arbitrary>], iteration_bounds = array<i64: 1>, scalar_prefetch = 0 : i64, scratch_operands = 2 : i64, tpu.core_type = #tpu.core_type<tc>, window_params = [{transform_indices = @transform_0, window_bounds = array<i64: 8, 2, 40>}, {pipeline_mode = #tpu.pipeline_mode<synchronous>, transform_indices = @transform_1, window_bounds = array<i64: 40, 32>}, {pipeline_mode = #tpu.pipeline_mode<synchronous>, transform_indices = @transform_2, window_bounds = array<i64: 1, 32>}, {pipeline_mode = #tpu.pipeline_mode<synchronous>, transform_indices = @transform_3, window_bounds = array<i64: 2, 64, 128>}, {pipeline_mode = #tpu.pipeline_mode<synchronous>, transform_indices = @transform_4, window_bounds = array<i64: 2, 1, 128>}, {pipeline_mode = #tpu.pipeline_mode<synchronous>, transform_indices = @transform_5, window_bounds = array<i64: 1, 32>}, {pipeline_mode = #tpu.pipeline_mode<synchronous>, transform_indices = @transform_6, window_bounds = array<i64: 1, 1>}, {transform_indices = @transform_7, window_bounds = array<i64: 2, 8>}]} {
    %c0_i32 = arith.constant 0 : i32
    %0 = arith.cmpi eq, %arg0, %c0_i32 : i32
    %1 = arith.extui %0 : i1 to i32
    %c0_i32_0 = arith.constant 0 : i32
    %2 = arith.cmpi ne, %1, %c0_i32_0 : i32
    scf.if %2 {
      %cst_146 = arith.constant 0.000000e+00 : f32
      %615 = vector.broadcast %cst_146 : f32 to vector<2x2x32xf32>
      %c0_147 = arith.constant 0 : index
      %c0_148 = arith.constant 0 : index
      %c0_149 = arith.constant 0 : index
      %616 = vector.load %arg9[%c0_147, %c0_148, %c0_149] : memref<2x2x32xf32, #tpu.memory_space<vmem>>, vector<2x2x32xf32>
      tpu.vector_store %arg9[%c0_147, %c0_148, %c0_149], %615 {strides = array<i32>} : memref<2x2x32xf32, #tpu.memory_space<vmem>>, vector<2x2x32xf32>,
      %cst_150 = arith.constant 0.000000e+00 : f32
      %617 = vector.broadcast %cst_150 : f32 to vector<2x2x32xf32>
      %c0_151 = arith.constant 0 : index
      %c0_152 = arith.constant 0 : index
      %c0_153 = arith.constant 0 : index
      %618 = vector.load %arg10[%c0_151, %c0_152, %c0_153] : memref<2x2x32xf32, #tpu.memory_space<vmem>>, vector<2x2x32xf32>
      tpu.vector_store %arg10[%c0_151, %c0_152, %c0_153], %617 {strides = array<i32>} : memref<2x2x32xf32, #tpu.memory_space<vmem>>, vector<2x2x32xf32>,
    } else {
    }
    %c0 = arith.constant 0 : index
    %c0_1 = arith.constant 0 : index
    %3 = vector.load %arg2[%c0, %c0_1] : memref<40x32xf32, #tpu.memory_space<vmem>>, vector<40x32xf32>
    %c0_2 = arith.constant 0 : index
    %c0_3 = arith.constant 0 : index
    %4 = vector.load %arg3[%c0_2, %c0_3] : memref<1x32xf32, #tpu.memory_space<vmem>>, vector<1x32xf32>
    %c0_4 = arith.constant 0 : index
    %c0_5 = arith.constant 0 : index
    %5 = vector.load %arg6[%c0_4, %c0_5] : memref<1x32xf32, #tpu.memory_space<vmem>>, vector<1x32xf32>
    %c0_6 = arith.constant 0 : index
    %c0_7 = arith.constant 0 : index
    %6 = vector.load %arg7[%c0_6, %c0_7] : memref<1x1xf32, #tpu.memory_space<vmem>>, vector<1x1xf32>
    %c0_8 = arith.constant 0 : index
    %c0_9 = arith.constant 0 : index
    %c0_10 = arith.constant 0 : index
    %7 = vector.load %arg4[%c0_8, %c0_9, %c0_10] : memref<2x64x128xf32, #tpu.memory_space<vmem>>, vector<1x64x128xf32>
    %8 = vector.shape_cast %7 : vector<1x64x128xf32> to vector<64x128xf32>
    %c1 = arith.constant 1 : index
    %c0_11 = arith.constant 0 : index
    %c0_12 = arith.constant 0 : index
    %9 = vector.load %arg4[%c1, %c0_11, %c0_12] : memref<2x64x128xf32, #tpu.memory_space<vmem>>, vector<1x64x128xf32>
    %10 = vector.shape_cast %9 : vector<1x64x128xf32> to vector<64x128xf32>
    %c0_13 = arith.constant 0 : index
    %c0_14 = arith.constant 0 : index
    %c0_15 = arith.constant 0 : index
    %11 = vector.load %arg5[%c0_13, %c0_14, %c0_15] : memref<2x1x128xf32, #tpu.memory_space<vmem>>, vector<1x1x128xf32>
    %12 = vector.shape_cast %11 : vector<1x1x128xf32> to vector<1x128xf32>
    %c1_16 = arith.constant 1 : index
    %c0_17 = arith.constant 0 : index
    %c0_18 = arith.constant 0 : index
    %13 = vector.load %arg5[%c1_16, %c0_17, %c0_18] : memref<2x1x128xf32, #tpu.memory_space<vmem>>, vector<1x1x128xf32>
    %14 = vector.shape_cast %13 : vector<1x1x128xf32> to vector<1x128xf32>
    %15 = tpu.iota {dimensions = array<i32: 1>} : vector<1x128xi32>
    %c64_i32 = arith.constant 64 : i32
    %16 = vector.broadcast %c64_i32 : i32 to vector<1x128xi32>
    %17 = arith.cmpi sge, %15, %16 : vector<1x128xi32>
    %c96_i32 = arith.constant 96 : i32
    %18 = vector.broadcast %c96_i32 : i32 to vector<1x128xi32>
    %19 = arith.cmpi slt, %15, %18 : vector<1x128xi32>
    %20 = arith.andi %17, %19 : vector<1x128xi1>
    %cst = arith.constant 1.000000e+00 : f32
    %cst_19 = arith.constant 5.000000e-01 : f32
    %21 = vector.broadcast %cst : f32 to vector<1x128xf32>
    %22 = vector.broadcast %cst_19 : f32 to vector<1x128xf32>
    %23 = arith.select %20, %21, %22 : vector<1x128xi1>, vector<1x128xf32>
    %c0_20 = arith.constant 0 : index
    %c0_21 = arith.constant 0 : index
    %c0_22 = arith.constant 0 : index
    %24 = vector.load %arg9[%c0_20, %c0_21, %c0_22] : memref<2x2x32xf32, #tpu.memory_space<vmem>>, vector<1x2x32xf32>
    %25 = vector.shape_cast %24 : vector<1x2x32xf32> to vector<2x32xf32>
    %c1_23 = arith.constant 1 : index
    %c0_24 = arith.constant 0 : index
    %c0_25 = arith.constant 0 : index
    %26 = vector.load %arg9[%c1_23, %c0_24, %c0_25] : memref<2x2x32xf32, #tpu.memory_space<vmem>>, vector<1x2x32xf32>
    %27 = vector.shape_cast %26 : vector<1x2x32xf32> to vector<2x32xf32>
    %c0_26 = arith.constant 0 : index
    %c0_27 = arith.constant 0 : index
    %c0_28 = arith.constant 0 : index
    %28 = vector.load %arg10[%c0_26, %c0_27, %c0_28] : memref<2x2x32xf32, #tpu.memory_space<vmem>>, vector<1x2x32xf32>
    %29 = vector.shape_cast %28 : vector<1x2x32xf32> to vector<2x32xf32>
    %c1_29 = arith.constant 1 : index
    %c0_30 = arith.constant 0 : index
    %c0_31 = arith.constant 0 : index
    %30 = vector.load %arg10[%c1_29, %c0_30, %c0_31] : memref<2x2x32xf32, #tpu.memory_space<vmem>>, vector<1x2x32xf32>
    %31 = vector.shape_cast %30 : vector<1x2x32xf32> to vector<2x32xf32>
    %32 = tpu.iota {dimensions = array<i32: 1>} : vector<1x8xi32>
    %cst_32 = arith.constant 0.000000e+00 : f32
    %33 = vector.broadcast %cst_32 : f32 to vector<2x8xf32>
    %c0_33 = arith.constant 0 : index
    %c0_34 = arith.constant 0 : index
    %c0_35 = arith.constant 0 : index
    %34 = vector.load %arg1[%c0_33, %c0_34, %c0_35] : memref<8x2x40xf32, #tpu.memory_space<vmem>>, vector<1x2x40xf32>
    %35 = vector.shape_cast %34 : vector<1x2x40xf32> to vector<2x40xf32>
    %cst_36 = arith.constant dense<0.000000e+00> : vector<2x32xf32>
    %36 = tpu.matmul %35, %3, %cst_36 {dimension_numbers = #tpu.dot_dimension_numbers<[1], [0], [0], [1], [0, 0, 1, 1], [], []>} : vector<2x40xf32>, vector<40x32xf32>, vector<2x32xf32> -> vector<2x32xf32>
    %37 = vector.broadcast %4 : vector<1x32xf32> to vector<2x32xf32>
    %38 = arith.addf %36, %37 : vector<2x32xf32>
    %39 = tpu.concatenate %38, %25 in 1 : vector<2x32xf32>, vector<2x32xf32> -> vector<2x64xf32>
    %cst_37 = arith.constant dense<0.000000e+00> : vector<2x128xf32>
    %40 = tpu.matmul %39, %8, %cst_37 {dimension_numbers = #tpu.dot_dimension_numbers<[1], [0], [0], [1], [0, 0, 1, 1], [], []>} : vector<2x64xf32>, vector<64x128xf32>, vector<2x128xf32> -> vector<2x128xf32>
    %41 = vector.broadcast %12 : vector<1x128xf32> to vector<2x128xf32>
    %42 = arith.addf %40, %41 : vector<2x128xf32>
    %43 = vector.broadcast %23 : vector<1x128xf32> to vector<2x128xf32>
    %44 = arith.mulf %42, %43 : vector<2x128xf32>
    %45 = math.tanh %44 : vector<2x128xf32>
    %cst_38 = arith.constant 5.000000e-01 : f32
    %46 = vector.broadcast %cst_38 : f32 to vector<2x128xf32>
    %47 = arith.mulf %46, %45 : vector<2x128xf32>
    %cst_39 = arith.constant 5.000000e-01 : f32
    %48 = vector.broadcast %cst_39 : f32 to vector<2x128xf32>
    %49 = arith.addf %47, %48 : vector<2x128xf32>
    %50 = vector.shape_cast %20 : vector<1x128xi1> to vector<1x128xi1>
    %51 = vector.broadcast %50 : vector<1x128xi1> to vector<2x128xi1>
    %52 = arith.select %51, %45, %49 : vector<2x128xi1>, vector<2x128xf32>
    %53 = vector.extract_strided_slice %52 {offsets = [0, 0], sizes = [2, 32], strides = [1, 1]} : vector<2x128xf32> to vector<2x32xf32>
    %54 = vector.extract_strided_slice %52 {offsets = [0, 32], sizes = [2, 32], strides = [1, 1]} : vector<2x128xf32> to vector<2x32xf32>
    %55 = vector.extract_strided_slice %52 {offsets = [0, 64], sizes = [2, 32], strides = [1, 1]} : vector<2x128xf32> to vector<2x32xf32>
    %56 = vector.extract_strided_slice %52 {offsets = [0, 96], sizes = [2, 32], strides = [1, 1]} : vector<2x128xf32> to vector<2x32xf32>
    %57 = arith.mulf %54, %29 : vector<2x32xf32>
    %58 = arith.mulf %53, %55 : vector<2x32xf32>
    %59 = arith.addf %57, %58 : vector<2x32xf32>
    %60 = math.tanh %59 : vector<2x32xf32>
    %61 = arith.mulf %56, %60 : vector<2x32xf32>
    %62 = tpu.concatenate %61, %27 in 1 : vector<2x32xf32>, vector<2x32xf32> -> vector<2x64xf32>
    %cst_40 = arith.constant dense<0.000000e+00> : vector<2x128xf32>
    %63 = tpu.matmul %62, %10, %cst_40 {dimension_numbers = #tpu.dot_dimension_numbers<[1], [0], [0], [1], [0, 0, 1, 1], [], []>} : vector<2x64xf32>, vector<64x128xf32>, vector<2x128xf32> -> vector<2x128xf32>
    %64 = vector.broadcast %14 : vector<1x128xf32> to vector<2x128xf32>
    %65 = arith.addf %63, %64 : vector<2x128xf32>
    %66 = vector.broadcast %23 : vector<1x128xf32> to vector<2x128xf32>
    %67 = arith.mulf %65, %66 : vector<2x128xf32>
    %68 = math.tanh %67 : vector<2x128xf32>
    %cst_41 = arith.constant 5.000000e-01 : f32
    %69 = vector.broadcast %cst_41 : f32 to vector<2x128xf32>
    %70 = arith.mulf %69, %68 : vector<2x128xf32>
    %cst_42 = arith.constant 5.000000e-01 : f32
    %71 = vector.broadcast %cst_42 : f32 to vector<2x128xf32>
    %72 = arith.addf %70, %71 : vector<2x128xf32>
    %73 = vector.shape_cast %20 : vector<1x128xi1> to vector<1x128xi1>
    %74 = vector.broadcast %73 : vector<1x128xi1> to vector<2x128xi1>
    %75 = arith.select %74, %68, %72 : vector<2x128xi1>, vector<2x128xf32>
    %76 = vector.extract_strided_slice %75 {offsets = [0, 0], sizes = [2, 32], strides = [1, 1]} : vector<2x128xf32> to vector<2x32xf32>
    %77 = vector.extract_strided_slice %75 {offsets = [0, 32], sizes = [2, 32], strides = [1, 1]} : vector<2x128xf32> to vector<2x32xf32>
    %78 = vector.extract_strided_slice %75 {offsets = [0, 64], sizes = [2, 32], strides = [1, 1]} : vector<2x128xf32> to vector<2x32xf32>
    %79 = vector.extract_strided_slice %75 {offsets = [0, 96], sizes = [2, 32], strides = [1, 1]} : vector<2x128xf32> to vector<2x32xf32>
    %80 = arith.mulf %77, %31 : vector<2x32xf32>
    %81 = arith.mulf %76, %78 : vector<2x32xf32>
    %82 = arith.addf %80, %81 : vector<2x32xf32>
    %83 = math.tanh %82 : vector<2x32xf32>
    %84 = arith.mulf %79, %83 : vector<2x32xf32>
    %85 = vector.broadcast %5 : vector<1x32xf32> to vector<2x32xf32>
    %86 = arith.mulf %84, %85 : vector<2x32xf32>
    %cst_43 = arith.constant dense<0.000000e+00> : vector<2xf32>
    %87 = vector.multi_reduction <add>, %86, %cst_43 [1] : vector<2x32xf32> to vector<2xf32>
    %88 = vector.shape_cast %87 : vector<2xf32> to vector<2x1xf32>
    %89 = vector.broadcast %6 : vector<1x1xf32> to vector<2x1xf32>
    %90 = arith.addf %88, %89 : vector<2x1xf32>
    %91 = arith.negf %90 : vector<2x1xf32>
    %92 = math.exp %91 : vector<2x1xf32>
    %cst_44 = arith.constant 1.000000e+00 : f32
    %93 = vector.broadcast %cst_44 : f32 to vector<2x1xf32>
    %94 = arith.addf %93, %92 : vector<2x1xf32>
    %95 = arith.divf %93, %94 : vector<2x1xf32>
    %c0_i32_45 = arith.constant 0 : i32
    %96 = vector.broadcast %c0_i32_45 : i32 to vector<1x8xi32>
    %97 = arith.cmpi eq, %32, %96 : vector<1x8xi32>
    %cst_46 = arith.constant 0.000000e+00 : f32
    %98 = vector.shape_cast %97 : vector<1x8xi1> to vector<1x8xi1>
    %99 = vector.broadcast %98 : vector<1x8xi1> to vector<2x8xi1>
    %100 = vector.shape_cast %95 : vector<2x1xf32> to vector<2x1xf32>
    %101 = vector.broadcast %100 : vector<2x1xf32> to vector<2x8xf32>
    %102 = vector.broadcast %cst_46 : f32 to vector<2x8xf32>
    %103 = arith.select %99, %101, %102 : vector<2x8xi1>, vector<2x8xf32>
    %104 = arith.addf %33, %103 : vector<2x8xf32>
    %c1_47 = arith.constant 1 : index
    %c0_48 = arith.constant 0 : index
    %c0_49 = arith.constant 0 : index
    %105 = vector.load %arg1[%c1_47, %c0_48, %c0_49] : memref<8x2x40xf32, #tpu.memory_space<vmem>>, vector<1x2x40xf32>
    %106 = vector.shape_cast %105 : vector<1x2x40xf32> to vector<2x40xf32>
    %cst_50 = arith.constant dense<0.000000e+00> : vector<2x32xf32>
    %107 = tpu.matmul %106, %3, %cst_50 {dimension_numbers = #tpu.dot_dimension_numbers<[1], [0], [0], [1], [0, 0, 1, 1], [], []>} : vector<2x40xf32>, vector<40x32xf32>, vector<2x32xf32> -> vector<2x32xf32>
    %108 = vector.broadcast %4 : vector<1x32xf32> to vector<2x32xf32>
    %109 = arith.addf %107, %108 : vector<2x32xf32>
    %110 = tpu.concatenate %109, %61 in 1 : vector<2x32xf32>, vector<2x32xf32> -> vector<2x64xf32>
    %cst_51 = arith.constant dense<0.000000e+00> : vector<2x128xf32>
    %111 = tpu.matmul %110, %8, %cst_51 {dimension_numbers = #tpu.dot_dimension_numbers<[1], [0], [0], [1], [0, 0, 1, 1], [], []>} : vector<2x64xf32>, vector<64x128xf32>, vector<2x128xf32> -> vector<2x128xf32>
    %112 = vector.broadcast %12 : vector<1x128xf32> to vector<2x128xf32>
    %113 = arith.addf %111, %112 : vector<2x128xf32>
    %114 = vector.broadcast %23 : vector<1x128xf32> to vector<2x128xf32>
    %115 = arith.mulf %113, %114 : vector<2x128xf32>
    %116 = math.tanh %115 : vector<2x128xf32>
    %cst_52 = arith.constant 5.000000e-01 : f32
    %117 = vector.broadcast %cst_52 : f32 to vector<2x128xf32>
    %118 = arith.mulf %117, %116 : vector<2x128xf32>
    %cst_53 = arith.constant 5.000000e-01 : f32
    %119 = vector.broadcast %cst_53 : f32 to vector<2x128xf32>
    %120 = arith.addf %118, %119 : vector<2x128xf32>
    %121 = vector.shape_cast %20 : vector<1x128xi1> to vector<1x128xi1>
    %122 = vector.broadcast %121 : vector<1x128xi1> to vector<2x128xi1>
    %123 = arith.select %122, %116, %120 : vector<2x128xi1>, vector<2x128xf32>
    %124 = vector.extract_strided_slice %123 {offsets = [0, 0], sizes = [2, 32], strides = [1, 1]} : vector<2x128xf32> to vector<2x32xf32>
    %125 = vector.extract_strided_slice %123 {offsets = [0, 32], sizes = [2, 32], strides = [1, 1]} : vector<2x128xf32> to vector<2x32xf32>
    %126 = vector.extract_strided_slice %123 {offsets = [0, 64], sizes = [2, 32], strides = [1, 1]} : vector<2x128xf32> to vector<2x32xf32>
    %127 = vector.extract_strided_slice %123 {offsets = [0, 96], sizes = [2, 32], strides = [1, 1]} : vector<2x128xf32> to vector<2x32xf32>
    %128 = arith.mulf %125, %59 : vector<2x32xf32>
    %129 = arith.mulf %124, %126 : vector<2x32xf32>
    %130 = arith.addf %128, %129 : vector<2x32xf32>
    %131 = math.tanh %130 : vector<2x32xf32>
    %132 = arith.mulf %127, %131 : vector<2x32xf32>
    %133 = tpu.concatenate %132, %84 in 1 : vector<2x32xf32>, vector<2x32xf32> -> vector<2x64xf32>
    %cst_54 = arith.constant dense<0.000000e+00> : vector<2x128xf32>
    %134 = tpu.matmul %133, %10, %cst_54 {dimension_numbers = #tpu.dot_dimension_numbers<[1], [0], [0], [1], [0, 0, 1, 1], [], []>} : vector<2x64xf32>, vector<64x128xf32>, vector<2x128xf32> -> vector<2x128xf32>
    %135 = vector.broadcast %14 : vector<1x128xf32> to vector<2x128xf32>
    %136 = arith.addf %134, %135 : vector<2x128xf32>
    %137 = vector.broadcast %23 : vector<1x128xf32> to vector<2x128xf32>
    %138 = arith.mulf %136, %137 : vector<2x128xf32>
    %139 = math.tanh %138 : vector<2x128xf32>
    %cst_55 = arith.constant 5.000000e-01 : f32
    %140 = vector.broadcast %cst_55 : f32 to vector<2x128xf32>
    %141 = arith.mulf %140, %139 : vector<2x128xf32>
    %cst_56 = arith.constant 5.000000e-01 : f32
    %142 = vector.broadcast %cst_56 : f32 to vector<2x128xf32>
    %143 = arith.addf %141, %142 : vector<2x128xf32>
    %144 = vector.shape_cast %20 : vector<1x128xi1> to vector<1x128xi1>
    %145 = vector.broadcast %144 : vector<1x128xi1> to vector<2x128xi1>
    %146 = arith.select %145, %139, %143 : vector<2x128xi1>, vector<2x128xf32>
    %147 = vector.extract_strided_slice %146 {offsets = [0, 0], sizes = [2, 32], strides = [1, 1]} : vector<2x128xf32> to vector<2x32xf32>
    %148 = vector.extract_strided_slice %146 {offsets = [0, 32], sizes = [2, 32], strides = [1, 1]} : vector<2x128xf32> to vector<2x32xf32>
    %149 = vector.extract_strided_slice %146 {offsets = [0, 64], sizes = [2, 32], strides = [1, 1]} : vector<2x128xf32> to vector<2x32xf32>
    %150 = vector.extract_strided_slice %146 {offsets = [0, 96], sizes = [2, 32], strides = [1, 1]} : vector<2x128xf32> to vector<2x32xf32>
    %151 = arith.mulf %148, %82 : vector<2x32xf32>
    %152 = arith.mulf %147, %149 : vector<2x32xf32>
    %153 = arith.addf %151, %152 : vector<2x32xf32>
    %154 = math.tanh %153 : vector<2x32xf32>
    %155 = arith.mulf %150, %154 : vector<2x32xf32>
    %156 = vector.broadcast %5 : vector<1x32xf32> to vector<2x32xf32>
    %157 = arith.mulf %155, %156 : vector<2x32xf32>
    %cst_57 = arith.constant dense<0.000000e+00> : vector<2xf32>
    %158 = vector.multi_reduction <add>, %157, %cst_57 [1] : vector<2x32xf32> to vector<2xf32>
    %159 = vector.shape_cast %158 : vector<2xf32> to vector<2x1xf32>
    %160 = vector.broadcast %6 : vector<1x1xf32> to vector<2x1xf32>
    %161 = arith.addf %159, %160 : vector<2x1xf32>
    %162 = arith.negf %161 : vector<2x1xf32>
    %163 = math.exp %162 : vector<2x1xf32>
    %cst_58 = arith.constant 1.000000e+00 : f32
    %164 = vector.broadcast %cst_58 : f32 to vector<2x1xf32>
    %165 = arith.addf %164, %163 : vector<2x1xf32>
    %166 = arith.divf %164, %165 : vector<2x1xf32>
    %c1_i32 = arith.constant 1 : i32
    %167 = vector.broadcast %c1_i32 : i32 to vector<1x8xi32>
    %168 = arith.cmpi eq, %32, %167 : vector<1x8xi32>
    %cst_59 = arith.constant 0.000000e+00 : f32
    %169 = vector.shape_cast %168 : vector<1x8xi1> to vector<1x8xi1>
    %170 = vector.broadcast %169 : vector<1x8xi1> to vector<2x8xi1>
    %171 = vector.shape_cast %166 : vector<2x1xf32> to vector<2x1xf32>
    %172 = vector.broadcast %171 : vector<2x1xf32> to vector<2x8xf32>
    %173 = vector.broadcast %cst_59 : f32 to vector<2x8xf32>
    %174 = arith.select %170, %172, %173 : vector<2x8xi1>, vector<2x8xf32>
    %175 = arith.addf %104, %174 : vector<2x8xf32>
    %c2 = arith.constant 2 : index
    %c0_60 = arith.constant 0 : index
    %c0_61 = arith.constant 0 : index
    %176 = vector.load %arg1[%c2, %c0_60, %c0_61] : memref<8x2x40xf32, #tpu.memory_space<vmem>>, vector<1x2x40xf32>
    %177 = vector.shape_cast %176 : vector<1x2x40xf32> to vector<2x40xf32>
    %cst_62 = arith.constant dense<0.000000e+00> : vector<2x32xf32>
    %178 = tpu.matmul %177, %3, %cst_62 {dimension_numbers = #tpu.dot_dimension_numbers<[1], [0], [0], [1], [0, 0, 1, 1], [], []>} : vector<2x40xf32>, vector<40x32xf32>, vector<2x32xf32> -> vector<2x32xf32>
    %179 = vector.broadcast %4 : vector<1x32xf32> to vector<2x32xf32>
    %180 = arith.addf %178, %179 : vector<2x32xf32>
    %181 = tpu.concatenate %180, %132 in 1 : vector<2x32xf32>, vector<2x32xf32> -> vector<2x64xf32>
    %cst_63 = arith.constant dense<0.000000e+00> : vector<2x128xf32>
    %182 = tpu.matmul %181, %8, %cst_63 {dimension_numbers = #tpu.dot_dimension_numbers<[1], [0], [0], [1], [0, 0, 1, 1], [], []>} : vector<2x64xf32>, vector<64x128xf32>, vector<2x128xf32> -> vector<2x128xf32>
    %183 = vector.broadcast %12 : vector<1x128xf32> to vector<2x128xf32>
    %184 = arith.addf %182, %183 : vector<2x128xf32>
    %185 = vector.broadcast %23 : vector<1x128xf32> to vector<2x128xf32>
    %186 = arith.mulf %184, %185 : vector<2x128xf32>
    %187 = math.tanh %186 : vector<2x128xf32>
    %cst_64 = arith.constant 5.000000e-01 : f32
    %188 = vector.broadcast %cst_64 : f32 to vector<2x128xf32>
    %189 = arith.mulf %188, %187 : vector<2x128xf32>
    %cst_65 = arith.constant 5.000000e-01 : f32
    %190 = vector.broadcast %cst_65 : f32 to vector<2x128xf32>
    %191 = arith.addf %189, %190 : vector<2x128xf32>
    %192 = vector.shape_cast %20 : vector<1x128xi1> to vector<1x128xi1>
    %193 = vector.broadcast %192 : vector<1x128xi1> to vector<2x128xi1>
    %194 = arith.select %193, %187, %191 : vector<2x128xi1>, vector<2x128xf32>
    %195 = vector.extract_strided_slice %194 {offsets = [0, 0], sizes = [2, 32], strides = [1, 1]} : vector<2x128xf32> to vector<2x32xf32>
    %196 = vector.extract_strided_slice %194 {offsets = [0, 32], sizes = [2, 32], strides = [1, 1]} : vector<2x128xf32> to vector<2x32xf32>
    %197 = vector.extract_strided_slice %194 {offsets = [0, 64], sizes = [2, 32], strides = [1, 1]} : vector<2x128xf32> to vector<2x32xf32>
    %198 = vector.extract_strided_slice %194 {offsets = [0, 96], sizes = [2, 32], strides = [1, 1]} : vector<2x128xf32> to vector<2x32xf32>
    %199 = arith.mulf %196, %130 : vector<2x32xf32>
    %200 = arith.mulf %195, %197 : vector<2x32xf32>
    %201 = arith.addf %199, %200 : vector<2x32xf32>
    %202 = math.tanh %201 : vector<2x32xf32>
    %203 = arith.mulf %198, %202 : vector<2x32xf32>
    %204 = tpu.concatenate %203, %155 in 1 : vector<2x32xf32>, vector<2x32xf32> -> vector<2x64xf32>
    %cst_66 = arith.constant dense<0.000000e+00> : vector<2x128xf32>
    %205 = tpu.matmul %204, %10, %cst_66 {dimension_numbers = #tpu.dot_dimension_numbers<[1], [0], [0], [1], [0, 0, 1, 1], [], []>} : vector<2x64xf32>, vector<64x128xf32>, vector<2x128xf32> -> vector<2x128xf32>
    %206 = vector.broadcast %14 : vector<1x128xf32> to vector<2x128xf32>
    %207 = arith.addf %205, %206 : vector<2x128xf32>
    %208 = vector.broadcast %23 : vector<1x128xf32> to vector<2x128xf32>
    %209 = arith.mulf %207, %208 : vector<2x128xf32>
    %210 = math.tanh %209 : vector<2x128xf32>
    %cst_67 = arith.constant 5.000000e-01 : f32
    %211 = vector.broadcast %cst_67 : f32 to vector<2x128xf32>
    %212 = arith.mulf %211, %210 : vector<2x128xf32>
    %cst_68 = arith.constant 5.000000e-01 : f32
    %213 = vector.broadcast %cst_68 : f32 to vector<2x128xf32>
    %214 = arith.addf %212, %213 : vector<2x128xf32>
    %215 = vector.shape_cast %20 : vector<1x128xi1> to vector<1x128xi1>
    %216 = vector.broadcast %215 : vector<1x128xi1> to vector<2x128xi1>
    %217 = arith.select %216, %210, %214 : vector<2x128xi1>, vector<2x128xf32>
    %218 = vector.extract_strided_slice %217 {offsets = [0, 0], sizes = [2, 32], strides = [1, 1]} : vector<2x128xf32> to vector<2x32xf32>
    %219 = vector.extract_strided_slice %217 {offsets = [0, 32], sizes = [2, 32], strides = [1, 1]} : vector<2x128xf32> to vector<2x32xf32>
    %220 = vector.extract_strided_slice %217 {offsets = [0, 64], sizes = [2, 32], strides = [1, 1]} : vector<2x128xf32> to vector<2x32xf32>
    %221 = vector.extract_strided_slice %217 {offsets = [0, 96], sizes = [2, 32], strides = [1, 1]} : vector<2x128xf32> to vector<2x32xf32>
    %222 = arith.mulf %219, %153 : vector<2x32xf32>
    %223 = arith.mulf %218, %220 : vector<2x32xf32>
    %224 = arith.addf %222, %223 : vector<2x32xf32>
    %225 = math.tanh %224 : vector<2x32xf32>
    %226 = arith.mulf %221, %225 : vector<2x32xf32>
    %227 = vector.broadcast %5 : vector<1x32xf32> to vector<2x32xf32>
    %228 = arith.mulf %226, %227 : vector<2x32xf32>
    %cst_69 = arith.constant dense<0.000000e+00> : vector<2xf32>
    %229 = vector.multi_reduction <add>, %228, %cst_69 [1] : vector<2x32xf32> to vector<2xf32>
    %230 = vector.shape_cast %229 : vector<2xf32> to vector<2x1xf32>
    %231 = vector.broadcast %6 : vector<1x1xf32> to vector<2x1xf32>
    %232 = arith.addf %230, %231 : vector<2x1xf32>
    %233 = arith.negf %232 : vector<2x1xf32>
    %234 = math.exp %233 : vector<2x1xf32>
    %cst_70 = arith.constant 1.000000e+00 : f32
    %235 = vector.broadcast %cst_70 : f32 to vector<2x1xf32>
    %236 = arith.addf %235, %234 : vector<2x1xf32>
    %237 = arith.divf %235, %236 : vector<2x1xf32>
    %c2_i32 = arith.constant 2 : i32
    %238 = vector.broadcast %c2_i32 : i32 to vector<1x8xi32>
    %239 = arith.cmpi eq, %32, %238 : vector<1x8xi32>
    %cst_71 = arith.constant 0.000000e+00 : f32
    %240 = vector.shape_cast %239 : vector<1x8xi1> to vector<1x8xi1>
    %241 = vector.broadcast %240 : vector<1x8xi1> to vector<2x8xi1>
    %242 = vector.shape_cast %237 : vector<2x1xf32> to vector<2x1xf32>
    %243 = vector.broadcast %242 : vector<2x1xf32> to vector<2x8xf32>
    %244 = vector.broadcast %cst_71 : f32 to vector<2x8xf32>
    %245 = arith.select %241, %243, %244 : vector<2x8xi1>, vector<2x8xf32>
    %246 = arith.addf %175, %245 : vector<2x8xf32>
    %c3 = arith.constant 3 : index
    %c0_72 = arith.constant 0 : index
    %c0_73 = arith.constant 0 : index
    %247 = vector.load %arg1[%c3, %c0_72, %c0_73] : memref<8x2x40xf32, #tpu.memory_space<vmem>>, vector<1x2x40xf32>
    %248 = vector.shape_cast %247 : vector<1x2x40xf32> to vector<2x40xf32>
    %cst_74 = arith.constant dense<0.000000e+00> : vector<2x32xf32>
    %249 = tpu.matmul %248, %3, %cst_74 {dimension_numbers = #tpu.dot_dimension_numbers<[1], [0], [0], [1], [0, 0, 1, 1], [], []>} : vector<2x40xf32>, vector<40x32xf32>, vector<2x32xf32> -> vector<2x32xf32>
    %250 = vector.broadcast %4 : vector<1x32xf32> to vector<2x32xf32>
    %251 = arith.addf %249, %250 : vector<2x32xf32>
    %252 = tpu.concatenate %251, %203 in 1 : vector<2x32xf32>, vector<2x32xf32> -> vector<2x64xf32>
    %cst_75 = arith.constant dense<0.000000e+00> : vector<2x128xf32>
    %253 = tpu.matmul %252, %8, %cst_75 {dimension_numbers = #tpu.dot_dimension_numbers<[1], [0], [0], [1], [0, 0, 1, 1], [], []>} : vector<2x64xf32>, vector<64x128xf32>, vector<2x128xf32> -> vector<2x128xf32>
    %254 = vector.broadcast %12 : vector<1x128xf32> to vector<2x128xf32>
    %255 = arith.addf %253, %254 : vector<2x128xf32>
    %256 = vector.broadcast %23 : vector<1x128xf32> to vector<2x128xf32>
    %257 = arith.mulf %255, %256 : vector<2x128xf32>
    %258 = math.tanh %257 : vector<2x128xf32>
    %cst_76 = arith.constant 5.000000e-01 : f32
    %259 = vector.broadcast %cst_76 : f32 to vector<2x128xf32>
    %260 = arith.mulf %259, %258 : vector<2x128xf32>
    %cst_77 = arith.constant 5.000000e-01 : f32
    %261 = vector.broadcast %cst_77 : f32 to vector<2x128xf32>
    %262 = arith.addf %260, %261 : vector<2x128xf32>
    %263 = vector.shape_cast %20 : vector<1x128xi1> to vector<1x128xi1>
    %264 = vector.broadcast %263 : vector<1x128xi1> to vector<2x128xi1>
    %265 = arith.select %264, %258, %262 : vector<2x128xi1>, vector<2x128xf32>
    %266 = vector.extract_strided_slice %265 {offsets = [0, 0], sizes = [2, 32], strides = [1, 1]} : vector<2x128xf32> to vector<2x32xf32>
    %267 = vector.extract_strided_slice %265 {offsets = [0, 32], sizes = [2, 32], strides = [1, 1]} : vector<2x128xf32> to vector<2x32xf32>
    %268 = vector.extract_strided_slice %265 {offsets = [0, 64], sizes = [2, 32], strides = [1, 1]} : vector<2x128xf32> to vector<2x32xf32>
    %269 = vector.extract_strided_slice %265 {offsets = [0, 96], sizes = [2, 32], strides = [1, 1]} : vector<2x128xf32> to vector<2x32xf32>
    %270 = arith.mulf %267, %201 : vector<2x32xf32>
    %271 = arith.mulf %266, %268 : vector<2x32xf32>
    %272 = arith.addf %270, %271 : vector<2x32xf32>
    %273 = math.tanh %272 : vector<2x32xf32>
    %274 = arith.mulf %269, %273 : vector<2x32xf32>
    %275 = tpu.concatenate %274, %226 in 1 : vector<2x32xf32>, vector<2x32xf32> -> vector<2x64xf32>
    %cst_78 = arith.constant dense<0.000000e+00> : vector<2x128xf32>
    %276 = tpu.matmul %275, %10, %cst_78 {dimension_numbers = #tpu.dot_dimension_numbers<[1], [0], [0], [1], [0, 0, 1, 1], [], []>} : vector<2x64xf32>, vector<64x128xf32>, vector<2x128xf32> -> vector<2x128xf32>
    %277 = vector.broadcast %14 : vector<1x128xf32> to vector<2x128xf32>
    %278 = arith.addf %276, %277 : vector<2x128xf32>
    %279 = vector.broadcast %23 : vector<1x128xf32> to vector<2x128xf32>
    %280 = arith.mulf %278, %279 : vector<2x128xf32>
    %281 = math.tanh %280 : vector<2x128xf32>
    %cst_79 = arith.constant 5.000000e-01 : f32
    %282 = vector.broadcast %cst_79 : f32 to vector<2x128xf32>
    %283 = arith.mulf %282, %281 : vector<2x128xf32>
    %cst_80 = arith.constant 5.000000e-01 : f32
    %284 = vector.broadcast %cst_80 : f32 to vector<2x128xf32>
    %285 = arith.addf %283, %284 : vector<2x128xf32>
    %286 = vector.shape_cast %20 : vector<1x128xi1> to vector<1x128xi1>
    %287 = vector.broadcast %286 : vector<1x128xi1> to vector<2x128xi1>
    %288 = arith.select %287, %281, %285 : vector<2x128xi1>, vector<2x128xf32>
    %289 = vector.extract_strided_slice %288 {offsets = [0, 0], sizes = [2, 32], strides = [1, 1]} : vector<2x128xf32> to vector<2x32xf32>
    %290 = vector.extract_strided_slice %288 {offsets = [0, 32], sizes = [2, 32], strides = [1, 1]} : vector<2x128xf32> to vector<2x32xf32>
    %291 = vector.extract_strided_slice %288 {offsets = [0, 64], sizes = [2, 32], strides = [1, 1]} : vector<2x128xf32> to vector<2x32xf32>
    %292 = vector.extract_strided_slice %288 {offsets = [0, 96], sizes = [2, 32], strides = [1, 1]} : vector<2x128xf32> to vector<2x32xf32>
    %293 = arith.mulf %290, %224 : vector<2x32xf32>
    %294 = arith.mulf %289, %291 : vector<2x32xf32>
    %295 = arith.addf %293, %294 : vector<2x32xf32>
    %296 = math.tanh %295 : vector<2x32xf32>
    %297 = arith.mulf %292, %296 : vector<2x32xf32>
    %298 = vector.broadcast %5 : vector<1x32xf32> to vector<2x32xf32>
    %299 = arith.mulf %297, %298 : vector<2x32xf32>
    %cst_81 = arith.constant dense<0.000000e+00> : vector<2xf32>
    %300 = vector.multi_reduction <add>, %299, %cst_81 [1] : vector<2x32xf32> to vector<2xf32>
    %301 = vector.shape_cast %300 : vector<2xf32> to vector<2x1xf32>
    %302 = vector.broadcast %6 : vector<1x1xf32> to vector<2x1xf32>
    %303 = arith.addf %301, %302 : vector<2x1xf32>
    %304 = arith.negf %303 : vector<2x1xf32>
    %305 = math.exp %304 : vector<2x1xf32>
    %cst_82 = arith.constant 1.000000e+00 : f32
    %306 = vector.broadcast %cst_82 : f32 to vector<2x1xf32>
    %307 = arith.addf %306, %305 : vector<2x1xf32>
    %308 = arith.divf %306, %307 : vector<2x1xf32>
    %c3_i32 = arith.constant 3 : i32
    %309 = vector.broadcast %c3_i32 : i32 to vector<1x8xi32>
    %310 = arith.cmpi eq, %32, %309 : vector<1x8xi32>
    %cst_83 = arith.constant 0.000000e+00 : f32
    %311 = vector.shape_cast %310 : vector<1x8xi1> to vector<1x8xi1>
    %312 = vector.broadcast %311 : vector<1x8xi1> to vector<2x8xi1>
    %313 = vector.shape_cast %308 : vector<2x1xf32> to vector<2x1xf32>
    %314 = vector.broadcast %313 : vector<2x1xf32> to vector<2x8xf32>
    %315 = vector.broadcast %cst_83 : f32 to vector<2x8xf32>
    %316 = arith.select %312, %314, %315 : vector<2x8xi1>, vector<2x8xf32>
    %317 = arith.addf %246, %316 : vector<2x8xf32>
    %c4 = arith.constant 4 : index
    %c0_84 = arith.constant 0 : index
    %c0_85 = arith.constant 0 : index
    %318 = vector.load %arg1[%c4, %c0_84, %c0_85] : memref<8x2x40xf32, #tpu.memory_space<vmem>>, vector<1x2x40xf32>
    %319 = vector.shape_cast %318 : vector<1x2x40xf32> to vector<2x40xf32>
    %cst_86 = arith.constant dense<0.000000e+00> : vector<2x32xf32>
    %320 = tpu.matmul %319, %3, %cst_86 {dimension_numbers = #tpu.dot_dimension_numbers<[1], [0], [0], [1], [0, 0, 1, 1], [], []>} : vector<2x40xf32>, vector<40x32xf32>, vector<2x32xf32> -> vector<2x32xf32>
    %321 = vector.broadcast %4 : vector<1x32xf32> to vector<2x32xf32>
    %322 = arith.addf %320, %321 : vector<2x32xf32>
    %323 = tpu.concatenate %322, %274 in 1 : vector<2x32xf32>, vector<2x32xf32> -> vector<2x64xf32>
    %cst_87 = arith.constant dense<0.000000e+00> : vector<2x128xf32>
    %324 = tpu.matmul %323, %8, %cst_87 {dimension_numbers = #tpu.dot_dimension_numbers<[1], [0], [0], [1], [0, 0, 1, 1], [], []>} : vector<2x64xf32>, vector<64x128xf32>, vector<2x128xf32> -> vector<2x128xf32>
    %325 = vector.broadcast %12 : vector<1x128xf32> to vector<2x128xf32>
    %326 = arith.addf %324, %325 : vector<2x128xf32>
    %327 = vector.broadcast %23 : vector<1x128xf32> to vector<2x128xf32>
    %328 = arith.mulf %326, %327 : vector<2x128xf32>
    %329 = math.tanh %328 : vector<2x128xf32>
    %cst_88 = arith.constant 5.000000e-01 : f32
    %330 = vector.broadcast %cst_88 : f32 to vector<2x128xf32>
    %331 = arith.mulf %330, %329 : vector<2x128xf32>
    %cst_89 = arith.constant 5.000000e-01 : f32
    %332 = vector.broadcast %cst_89 : f32 to vector<2x128xf32>
    %333 = arith.addf %331, %332 : vector<2x128xf32>
    %334 = vector.shape_cast %20 : vector<1x128xi1> to vector<1x128xi1>
    %335 = vector.broadcast %334 : vector<1x128xi1> to vector<2x128xi1>
    %336 = arith.select %335, %329, %333 : vector<2x128xi1>, vector<2x128xf32>
    %337 = vector.extract_strided_slice %336 {offsets = [0, 0], sizes = [2, 32], strides = [1, 1]} : vector<2x128xf32> to vector<2x32xf32>
    %338 = vector.extract_strided_slice %336 {offsets = [0, 32], sizes = [2, 32], strides = [1, 1]} : vector<2x128xf32> to vector<2x32xf32>
    %339 = vector.extract_strided_slice %336 {offsets = [0, 64], sizes = [2, 32], strides = [1, 1]} : vector<2x128xf32> to vector<2x32xf32>
    %340 = vector.extract_strided_slice %336 {offsets = [0, 96], sizes = [2, 32], strides = [1, 1]} : vector<2x128xf32> to vector<2x32xf32>
    %341 = arith.mulf %338, %272 : vector<2x32xf32>
    %342 = arith.mulf %337, %339 : vector<2x32xf32>
    %343 = arith.addf %341, %342 : vector<2x32xf32>
    %344 = math.tanh %343 : vector<2x32xf32>
    %345 = arith.mulf %340, %344 : vector<2x32xf32>
    %346 = tpu.concatenate %345, %297 in 1 : vector<2x32xf32>, vector<2x32xf32> -> vector<2x64xf32>
    %cst_90 = arith.constant dense<0.000000e+00> : vector<2x128xf32>
    %347 = tpu.matmul %346, %10, %cst_90 {dimension_numbers = #tpu.dot_dimension_numbers<[1], [0], [0], [1], [0, 0, 1, 1], [], []>} : vector<2x64xf32>, vector<64x128xf32>, vector<2x128xf32> -> vector<2x128xf32>
    %348 = vector.broadcast %14 : vector<1x128xf32> to vector<2x128xf32>
    %349 = arith.addf %347, %348 : vector<2x128xf32>
    %350 = vector.broadcast %23 : vector<1x128xf32> to vector<2x128xf32>
    %351 = arith.mulf %349, %350 : vector<2x128xf32>
    %352 = math.tanh %351 : vector<2x128xf32>
    %cst_91 = arith.constant 5.000000e-01 : f32
    %353 = vector.broadcast %cst_91 : f32 to vector<2x128xf32>
    %354 = arith.mulf %353, %352 : vector<2x128xf32>
    %cst_92 = arith.constant 5.000000e-01 : f32
    %355 = vector.broadcast %cst_92 : f32 to vector<2x128xf32>
    %356 = arith.addf %354, %355 : vector<2x128xf32>
    %357 = vector.shape_cast %20 : vector<1x128xi1> to vector<1x128xi1>
    %358 = vector.broadcast %357 : vector<1x128xi1> to vector<2x128xi1>
    %359 = arith.select %358, %352, %356 : vector<2x128xi1>, vector<2x128xf32>
    %360 = vector.extract_strided_slice %359 {offsets = [0, 0], sizes = [2, 32], strides = [1, 1]} : vector<2x128xf32> to vector<2x32xf32>
    %361 = vector.extract_strided_slice %359 {offsets = [0, 32], sizes = [2, 32], strides = [1, 1]} : vector<2x128xf32> to vector<2x32xf32>
    %362 = vector.extract_strided_slice %359 {offsets = [0, 64], sizes = [2, 32], strides = [1, 1]} : vector<2x128xf32> to vector<2x32xf32>
    %363 = vector.extract_strided_slice %359 {offsets = [0, 96], sizes = [2, 32], strides = [1, 1]} : vector<2x128xf32> to vector<2x32xf32>
    %364 = arith.mulf %361, %295 : vector<2x32xf32>
    %365 = arith.mulf %360, %362 : vector<2x32xf32>
    %366 = arith.addf %364, %365 : vector<2x32xf32>
    %367 = math.tanh %366 : vector<2x32xf32>
    %368 = arith.mulf %363, %367 : vector<2x32xf32>
    %369 = vector.broadcast %5 : vector<1x32xf32> to vector<2x32xf32>
    %370 = arith.mulf %368, %369 : vector<2x32xf32>
    %cst_93 = arith.constant dense<0.000000e+00> : vector<2xf32>
    %371 = vector.multi_reduction <add>, %370, %cst_93 [1] : vector<2x32xf32> to vector<2xf32>
    %372 = vector.shape_cast %371 : vector<2xf32> to vector<2x1xf32>
    %373 = vector.broadcast %6 : vector<1x1xf32> to vector<2x1xf32>
    %374 = arith.addf %372, %373 : vector<2x1xf32>
    %375 = arith.negf %374 : vector<2x1xf32>
    %376 = math.exp %375 : vector<2x1xf32>
    %cst_94 = arith.constant 1.000000e+00 : f32
    %377 = vector.broadcast %cst_94 : f32 to vector<2x1xf32>
    %378 = arith.addf %377, %376 : vector<2x1xf32>
    %379 = arith.divf %377, %378 : vector<2x1xf32>
    %c4_i32 = arith.constant 4 : i32
    %380 = vector.broadcast %c4_i32 : i32 to vector<1x8xi32>
    %381 = arith.cmpi eq, %32, %380 : vector<1x8xi32>
    %cst_95 = arith.constant 0.000000e+00 : f32
    %382 = vector.shape_cast %381 : vector<1x8xi1> to vector<1x8xi1>
    %383 = vector.broadcast %382 : vector<1x8xi1> to vector<2x8xi1>
    %384 = vector.shape_cast %379 : vector<2x1xf32> to vector<2x1xf32>
    %385 = vector.broadcast %384 : vector<2x1xf32> to vector<2x8xf32>
    %386 = vector.broadcast %cst_95 : f32 to vector<2x8xf32>
    %387 = arith.select %383, %385, %386 : vector<2x8xi1>, vector<2x8xf32>
    %388 = arith.addf %317, %387 : vector<2x8xf32>
    %c5 = arith.constant 5 : index
    %c0_96 = arith.constant 0 : index
    %c0_97 = arith.constant 0 : index
    %389 = vector.load %arg1[%c5, %c0_96, %c0_97] : memref<8x2x40xf32, #tpu.memory_space<vmem>>, vector<1x2x40xf32>
    %390 = vector.shape_cast %389 : vector<1x2x40xf32> to vector<2x40xf32>
    %cst_98 = arith.constant dense<0.000000e+00> : vector<2x32xf32>
    %391 = tpu.matmul %390, %3, %cst_98 {dimension_numbers = #tpu.dot_dimension_numbers<[1], [0], [0], [1], [0, 0, 1, 1], [], []>} : vector<2x40xf32>, vector<40x32xf32>, vector<2x32xf32> -> vector<2x32xf32>
    %392 = vector.broadcast %4 : vector<1x32xf32> to vector<2x32xf32>
    %393 = arith.addf %391, %392 : vector<2x32xf32>
    %394 = tpu.concatenate %393, %345 in 1 : vector<2x32xf32>, vector<2x32xf32> -> vector<2x64xf32>
    %cst_99 = arith.constant dense<0.000000e+00> : vector<2x128xf32>
    %395 = tpu.matmul %394, %8, %cst_99 {dimension_numbers = #tpu.dot_dimension_numbers<[1], [0], [0], [1], [0, 0, 1, 1], [], []>} : vector<2x64xf32>, vector<64x128xf32>, vector<2x128xf32> -> vector<2x128xf32>
    %396 = vector.broadcast %12 : vector<1x128xf32> to vector<2x128xf32>
    %397 = arith.addf %395, %396 : vector<2x128xf32>
    %398 = vector.broadcast %23 : vector<1x128xf32> to vector<2x128xf32>
    %399 = arith.mulf %397, %398 : vector<2x128xf32>
    %400 = math.tanh %399 : vector<2x128xf32>
    %cst_100 = arith.constant 5.000000e-01 : f32
    %401 = vector.broadcast %cst_100 : f32 to vector<2x128xf32>
    %402 = arith.mulf %401, %400 : vector<2x128xf32>
    %cst_101 = arith.constant 5.000000e-01 : f32
    %403 = vector.broadcast %cst_101 : f32 to vector<2x128xf32>
    %404 = arith.addf %402, %403 : vector<2x128xf32>
    %405 = vector.shape_cast %20 : vector<1x128xi1> to vector<1x128xi1>
    %406 = vector.broadcast %405 : vector<1x128xi1> to vector<2x128xi1>
    %407 = arith.select %406, %400, %404 : vector<2x128xi1>, vector<2x128xf32>
    %408 = vector.extract_strided_slice %407 {offsets = [0, 0], sizes = [2, 32], strides = [1, 1]} : vector<2x128xf32> to vector<2x32xf32>
    %409 = vector.extract_strided_slice %407 {offsets = [0, 32], sizes = [2, 32], strides = [1, 1]} : vector<2x128xf32> to vector<2x32xf32>
    %410 = vector.extract_strided_slice %407 {offsets = [0, 64], sizes = [2, 32], strides = [1, 1]} : vector<2x128xf32> to vector<2x32xf32>
    %411 = vector.extract_strided_slice %407 {offsets = [0, 96], sizes = [2, 32], strides = [1, 1]} : vector<2x128xf32> to vector<2x32xf32>
    %412 = arith.mulf %409, %343 : vector<2x32xf32>
    %413 = arith.mulf %408, %410 : vector<2x32xf32>
    %414 = arith.addf %412, %413 : vector<2x32xf32>
    %415 = math.tanh %414 : vector<2x32xf32>
    %416 = arith.mulf %411, %415 : vector<2x32xf32>
    %417 = tpu.concatenate %416, %368 in 1 : vector<2x32xf32>, vector<2x32xf32> -> vector<2x64xf32>
    %cst_102 = arith.constant dense<0.000000e+00> : vector<2x128xf32>
    %418 = tpu.matmul %417, %10, %cst_102 {dimension_numbers = #tpu.dot_dimension_numbers<[1], [0], [0], [1], [0, 0, 1, 1], [], []>} : vector<2x64xf32>, vector<64x128xf32>, vector<2x128xf32> -> vector<2x128xf32>
    %419 = vector.broadcast %14 : vector<1x128xf32> to vector<2x128xf32>
    %420 = arith.addf %418, %419 : vector<2x128xf32>
    %421 = vector.broadcast %23 : vector<1x128xf32> to vector<2x128xf32>
    %422 = arith.mulf %420, %421 : vector<2x128xf32>
    %423 = math.tanh %422 : vector<2x128xf32>
    %cst_103 = arith.constant 5.000000e-01 : f32
    %424 = vector.broadcast %cst_103 : f32 to vector<2x128xf32>
    %425 = arith.mulf %424, %423 : vector<2x128xf32>
    %cst_104 = arith.constant 5.000000e-01 : f32
    %426 = vector.broadcast %cst_104 : f32 to vector<2x128xf32>
    %427 = arith.addf %425, %426 : vector<2x128xf32>
    %428 = vector.shape_cast %20 : vector<1x128xi1> to vector<1x128xi1>
    %429 = vector.broadcast %428 : vector<1x128xi1> to vector<2x128xi1>
    %430 = arith.select %429, %423, %427 : vector<2x128xi1>, vector<2x128xf32>
    %431 = vector.extract_strided_slice %430 {offsets = [0, 0], sizes = [2, 32], strides = [1, 1]} : vector<2x128xf32> to vector<2x32xf32>
    %432 = vector.extract_strided_slice %430 {offsets = [0, 32], sizes = [2, 32], strides = [1, 1]} : vector<2x128xf32> to vector<2x32xf32>
    %433 = vector.extract_strided_slice %430 {offsets = [0, 64], sizes = [2, 32], strides = [1, 1]} : vector<2x128xf32> to vector<2x32xf32>
    %434 = vector.extract_strided_slice %430 {offsets = [0, 96], sizes = [2, 32], strides = [1, 1]} : vector<2x128xf32> to vector<2x32xf32>
    %435 = arith.mulf %432, %366 : vector<2x32xf32>
    %436 = arith.mulf %431, %433 : vector<2x32xf32>
    %437 = arith.addf %435, %436 : vector<2x32xf32>
    %438 = math.tanh %437 : vector<2x32xf32>
    %439 = arith.mulf %434, %438 : vector<2x32xf32>
    %440 = vector.broadcast %5 : vector<1x32xf32> to vector<2x32xf32>
    %441 = arith.mulf %439, %440 : vector<2x32xf32>
    %cst_105 = arith.constant dense<0.000000e+00> : vector<2xf32>
    %442 = vector.multi_reduction <add>, %441, %cst_105 [1] : vector<2x32xf32> to vector<2xf32>
    %443 = vector.shape_cast %442 : vector<2xf32> to vector<2x1xf32>
    %444 = vector.broadcast %6 : vector<1x1xf32> to vector<2x1xf32>
    %445 = arith.addf %443, %444 : vector<2x1xf32>
    %446 = arith.negf %445 : vector<2x1xf32>
    %447 = math.exp %446 : vector<2x1xf32>
    %cst_106 = arith.constant 1.000000e+00 : f32
    %448 = vector.broadcast %cst_106 : f32 to vector<2x1xf32>
    %449 = arith.addf %448, %447 : vector<2x1xf32>
    %450 = arith.divf %448, %449 : vector<2x1xf32>
    %c5_i32 = arith.constant 5 : i32
    %451 = vector.broadcast %c5_i32 : i32 to vector<1x8xi32>
    %452 = arith.cmpi eq, %32, %451 : vector<1x8xi32>
    %cst_107 = arith.constant 0.000000e+00 : f32
    %453 = vector.shape_cast %452 : vector<1x8xi1> to vector<1x8xi1>
    %454 = vector.broadcast %453 : vector<1x8xi1> to vector<2x8xi1>
    %455 = vector.shape_cast %450 : vector<2x1xf32> to vector<2x1xf32>
    %456 = vector.broadcast %455 : vector<2x1xf32> to vector<2x8xf32>
    %457 = vector.broadcast %cst_107 : f32 to vector<2x8xf32>
    %458 = arith.select %454, %456, %457 : vector<2x8xi1>, vector<2x8xf32>
    %459 = arith.addf %388, %458 : vector<2x8xf32>
    %c6 = arith.constant 6 : index
    %c0_108 = arith.constant 0 : index
    %c0_109 = arith.constant 0 : index
    %460 = vector.load %arg1[%c6, %c0_108, %c0_109] : memref<8x2x40xf32, #tpu.memory_space<vmem>>, vector<1x2x40xf32>
    %461 = vector.shape_cast %460 : vector<1x2x40xf32> to vector<2x40xf32>
    %cst_110 = arith.constant dense<0.000000e+00> : vector<2x32xf32>
    %462 = tpu.matmul %461, %3, %cst_110 {dimension_numbers = #tpu.dot_dimension_numbers<[1], [0], [0], [1], [0, 0, 1, 1], [], []>} : vector<2x40xf32>, vector<40x32xf32>, vector<2x32xf32> -> vector<2x32xf32>
    %463 = vector.broadcast %4 : vector<1x32xf32> to vector<2x32xf32>
    %464 = arith.addf %462, %463 : vector<2x32xf32>
    %465 = tpu.concatenate %464, %416 in 1 : vector<2x32xf32>, vector<2x32xf32> -> vector<2x64xf32>
    %cst_111 = arith.constant dense<0.000000e+00> : vector<2x128xf32>
    %466 = tpu.matmul %465, %8, %cst_111 {dimension_numbers = #tpu.dot_dimension_numbers<[1], [0], [0], [1], [0, 0, 1, 1], [], []>} : vector<2x64xf32>, vector<64x128xf32>, vector<2x128xf32> -> vector<2x128xf32>
    %467 = vector.broadcast %12 : vector<1x128xf32> to vector<2x128xf32>
    %468 = arith.addf %466, %467 : vector<2x128xf32>
    %469 = vector.broadcast %23 : vector<1x128xf32> to vector<2x128xf32>
    %470 = arith.mulf %468, %469 : vector<2x128xf32>
    %471 = math.tanh %470 : vector<2x128xf32>
    %cst_112 = arith.constant 5.000000e-01 : f32
    %472 = vector.broadcast %cst_112 : f32 to vector<2x128xf32>
    %473 = arith.mulf %472, %471 : vector<2x128xf32>
    %cst_113 = arith.constant 5.000000e-01 : f32
    %474 = vector.broadcast %cst_113 : f32 to vector<2x128xf32>
    %475 = arith.addf %473, %474 : vector<2x128xf32>
    %476 = vector.shape_cast %20 : vector<1x128xi1> to vector<1x128xi1>
    %477 = vector.broadcast %476 : vector<1x128xi1> to vector<2x128xi1>
    %478 = arith.select %477, %471, %475 : vector<2x128xi1>, vector<2x128xf32>
    %479 = vector.extract_strided_slice %478 {offsets = [0, 0], sizes = [2, 32], strides = [1, 1]} : vector<2x128xf32> to vector<2x32xf32>
    %480 = vector.extract_strided_slice %478 {offsets = [0, 32], sizes = [2, 32], strides = [1, 1]} : vector<2x128xf32> to vector<2x32xf32>
    %481 = vector.extract_strided_slice %478 {offsets = [0, 64], sizes = [2, 32], strides = [1, 1]} : vector<2x128xf32> to vector<2x32xf32>
    %482 = vector.extract_strided_slice %478 {offsets = [0, 96], sizes = [2, 32], strides = [1, 1]} : vector<2x128xf32> to vector<2x32xf32>
    %483 = arith.mulf %480, %414 : vector<2x32xf32>
    %484 = arith.mulf %479, %481 : vector<2x32xf32>
    %485 = arith.addf %483, %484 : vector<2x32xf32>
    %486 = math.tanh %485 : vector<2x32xf32>
    %487 = arith.mulf %482, %486 : vector<2x32xf32>
    %488 = tpu.concatenate %487, %439 in 1 : vector<2x32xf32>, vector<2x32xf32> -> vector<2x64xf32>
    %cst_114 = arith.constant dense<0.000000e+00> : vector<2x128xf32>
    %489 = tpu.matmul %488, %10, %cst_114 {dimension_numbers = #tpu.dot_dimension_numbers<[1], [0], [0], [1], [0, 0, 1, 1], [], []>} : vector<2x64xf32>, vector<64x128xf32>, vector<2x128xf32> -> vector<2x128xf32>
    %490 = vector.broadcast %14 : vector<1x128xf32> to vector<2x128xf32>
    %491 = arith.addf %489, %490 : vector<2x128xf32>
    %492 = vector.broadcast %23 : vector<1x128xf32> to vector<2x128xf32>
    %493 = arith.mulf %491, %492 : vector<2x128xf32>
    %494 = math.tanh %493 : vector<2x128xf32>
    %cst_115 = arith.constant 5.000000e-01 : f32
    %495 = vector.broadcast %cst_115 : f32 to vector<2x128xf32>
    %496 = arith.mulf %495, %494 : vector<2x128xf32>
    %cst_116 = arith.constant 5.000000e-01 : f32
    %497 = vector.broadcast %cst_116 : f32 to vector<2x128xf32>
    %498 = arith.addf %496, %497 : vector<2x128xf32>
    %499 = vector.shape_cast %20 : vector<1x128xi1> to vector<1x128xi1>
    %500 = vector.broadcast %499 : vector<1x128xi1> to vector<2x128xi1>
    %501 = arith.select %500, %494, %498 : vector<2x128xi1>, vector<2x128xf32>
    %502 = vector.extract_strided_slice %501 {offsets = [0, 0], sizes = [2, 32], strides = [1, 1]} : vector<2x128xf32> to vector<2x32xf32>
    %503 = vector.extract_strided_slice %501 {offsets = [0, 32], sizes = [2, 32], strides = [1, 1]} : vector<2x128xf32> to vector<2x32xf32>
    %504 = vector.extract_strided_slice %501 {offsets = [0, 64], sizes = [2, 32], strides = [1, 1]} : vector<2x128xf32> to vector<2x32xf32>
    %505 = vector.extract_strided_slice %501 {offsets = [0, 96], sizes = [2, 32], strides = [1, 1]} : vector<2x128xf32> to vector<2x32xf32>
    %506 = arith.mulf %503, %437 : vector<2x32xf32>
    %507 = arith.mulf %502, %504 : vector<2x32xf32>
    %508 = arith.addf %506, %507 : vector<2x32xf32>
    %509 = math.tanh %508 : vector<2x32xf32>
    %510 = arith.mulf %505, %509 : vector<2x32xf32>
    %511 = vector.broadcast %5 : vector<1x32xf32> to vector<2x32xf32>
    %512 = arith.mulf %510, %511 : vector<2x32xf32>
    %cst_117 = arith.constant dense<0.000000e+00> : vector<2xf32>
    %513 = vector.multi_reduction <add>, %512, %cst_117 [1] : vector<2x32xf32> to vector<2xf32>
    %514 = vector.shape_cast %513 : vector<2xf32> to vector<2x1xf32>
    %515 = vector.broadcast %6 : vector<1x1xf32> to vector<2x1xf32>
    %516 = arith.addf %514, %515 : vector<2x1xf32>
    %517 = arith.negf %516 : vector<2x1xf32>
    %518 = math.exp %517 : vector<2x1xf32>
    %cst_118 = arith.constant 1.000000e+00 : f32
    %519 = vector.broadcast %cst_118 : f32 to vector<2x1xf32>
    %520 = arith.addf %519, %518 : vector<2x1xf32>
    %521 = arith.divf %519, %520 : vector<2x1xf32>
    %c6_i32 = arith.constant 6 : i32
    %522 = vector.broadcast %c6_i32 : i32 to vector<1x8xi32>
    %523 = arith.cmpi eq, %32, %522 : vector<1x8xi32>
    %cst_119 = arith.constant 0.000000e+00 : f32
    %524 = vector.shape_cast %523 : vector<1x8xi1> to vector<1x8xi1>
    %525 = vector.broadcast %524 : vector<1x8xi1> to vector<2x8xi1>
    %526 = vector.shape_cast %521 : vector<2x1xf32> to vector<2x1xf32>
    %527 = vector.broadcast %526 : vector<2x1xf32> to vector<2x8xf32>
    %528 = vector.broadcast %cst_119 : f32 to vector<2x8xf32>
    %529 = arith.select %525, %527, %528 : vector<2x8xi1>, vector<2x8xf32>
    %530 = arith.addf %459, %529 : vector<2x8xf32>
    %c7 = arith.constant 7 : index
    %c0_120 = arith.constant 0 : index
    %c0_121 = arith.constant 0 : index
    %531 = vector.load %arg1[%c7, %c0_120, %c0_121] : memref<8x2x40xf32, #tpu.memory_space<vmem>>, vector<1x2x40xf32>
    %532 = vector.shape_cast %531 : vector<1x2x40xf32> to vector<2x40xf32>
    %cst_122 = arith.constant dense<0.000000e+00> : vector<2x32xf32>
    %533 = tpu.matmul %532, %3, %cst_122 {dimension_numbers = #tpu.dot_dimension_numbers<[1], [0], [0], [1], [0, 0, 1, 1], [], []>} : vector<2x40xf32>, vector<40x32xf32>, vector<2x32xf32> -> vector<2x32xf32>
    %534 = vector.broadcast %4 : vector<1x32xf32> to vector<2x32xf32>
    %535 = arith.addf %533, %534 : vector<2x32xf32>
    %536 = tpu.concatenate %535, %487 in 1 : vector<2x32xf32>, vector<2x32xf32> -> vector<2x64xf32>
    %cst_123 = arith.constant dense<0.000000e+00> : vector<2x128xf32>
    %537 = tpu.matmul %536, %8, %cst_123 {dimension_numbers = #tpu.dot_dimension_numbers<[1], [0], [0], [1], [0, 0, 1, 1], [], []>} : vector<2x64xf32>, vector<64x128xf32>, vector<2x128xf32> -> vector<2x128xf32>
    %538 = vector.broadcast %12 : vector<1x128xf32> to vector<2x128xf32>
    %539 = arith.addf %537, %538 : vector<2x128xf32>
    %540 = vector.broadcast %23 : vector<1x128xf32> to vector<2x128xf32>
    %541 = arith.mulf %539, %540 : vector<2x128xf32>
    %542 = math.tanh %541 : vector<2x128xf32>
    %cst_124 = arith.constant 5.000000e-01 : f32
    %543 = vector.broadcast %cst_124 : f32 to vector<2x128xf32>
    %544 = arith.mulf %543, %542 : vector<2x128xf32>
    %cst_125 = arith.constant 5.000000e-01 : f32
    %545 = vector.broadcast %cst_125 : f32 to vector<2x128xf32>
    %546 = arith.addf %544, %545 : vector<2x128xf32>
    %547 = vector.shape_cast %20 : vector<1x128xi1> to vector<1x128xi1>
    %548 = vector.broadcast %547 : vector<1x128xi1> to vector<2x128xi1>
    %549 = arith.select %548, %542, %546 : vector<2x128xi1>, vector<2x128xf32>
    %550 = vector.extract_strided_slice %549 {offsets = [0, 0], sizes = [2, 32], strides = [1, 1]} : vector<2x128xf32> to vector<2x32xf32>
    %551 = vector.extract_strided_slice %549 {offsets = [0, 32], sizes = [2, 32], strides = [1, 1]} : vector<2x128xf32> to vector<2x32xf32>
    %552 = vector.extract_strided_slice %549 {offsets = [0, 64], sizes = [2, 32], strides = [1, 1]} : vector<2x128xf32> to vector<2x32xf32>
    %553 = vector.extract_strided_slice %549 {offsets = [0, 96], sizes = [2, 32], strides = [1, 1]} : vector<2x128xf32> to vector<2x32xf32>
    %554 = arith.mulf %551, %485 : vector<2x32xf32>
    %555 = arith.mulf %550, %552 : vector<2x32xf32>
    %556 = arith.addf %554, %555 : vector<2x32xf32>
    %557 = math.tanh %556 : vector<2x32xf32>
    %558 = arith.mulf %553, %557 : vector<2x32xf32>
    %559 = tpu.concatenate %558, %510 in 1 : vector<2x32xf32>, vector<2x32xf32> -> vector<2x64xf32>
    %cst_126 = arith.constant dense<0.000000e+00> : vector<2x128xf32>
    %560 = tpu.matmul %559, %10, %cst_126 {dimension_numbers = #tpu.dot_dimension_numbers<[1], [0], [0], [1], [0, 0, 1, 1], [], []>} : vector<2x64xf32>, vector<64x128xf32>, vector<2x128xf32> -> vector<2x128xf32>
    %561 = vector.broadcast %14 : vector<1x128xf32> to vector<2x128xf32>
    %562 = arith.addf %560, %561 : vector<2x128xf32>
    %563 = vector.broadcast %23 : vector<1x128xf32> to vector<2x128xf32>
    %564 = arith.mulf %562, %563 : vector<2x128xf32>
    %565 = math.tanh %564 : vector<2x128xf32>
    %cst_127 = arith.constant 5.000000e-01 : f32
    %566 = vector.broadcast %cst_127 : f32 to vector<2x128xf32>
    %567 = arith.mulf %566, %565 : vector<2x128xf32>
    %cst_128 = arith.constant 5.000000e-01 : f32
    %568 = vector.broadcast %cst_128 : f32 to vector<2x128xf32>
    %569 = arith.addf %567, %568 : vector<2x128xf32>
    %570 = vector.shape_cast %20 : vector<1x128xi1> to vector<1x128xi1>
    %571 = vector.broadcast %570 : vector<1x128xi1> to vector<2x128xi1>
    %572 = arith.select %571, %565, %569 : vector<2x128xi1>, vector<2x128xf32>
    %573 = vector.extract_strided_slice %572 {offsets = [0, 0], sizes = [2, 32], strides = [1, 1]} : vector<2x128xf32> to vector<2x32xf32>
    %574 = vector.extract_strided_slice %572 {offsets = [0, 32], sizes = [2, 32], strides = [1, 1]} : vector<2x128xf32> to vector<2x32xf32>
    %575 = vector.extract_strided_slice %572 {offsets = [0, 64], sizes = [2, 32], strides = [1, 1]} : vector<2x128xf32> to vector<2x32xf32>
    %576 = vector.extract_strided_slice %572 {offsets = [0, 96], sizes = [2, 32], strides = [1, 1]} : vector<2x128xf32> to vector<2x32xf32>
    %577 = arith.mulf %574, %508 : vector<2x32xf32>
    %578 = arith.mulf %573, %575 : vector<2x32xf32>
    %579 = arith.addf %577, %578 : vector<2x32xf32>
    %580 = math.tanh %579 : vector<2x32xf32>
    %581 = arith.mulf %576, %580 : vector<2x32xf32>
    %582 = vector.broadcast %5 : vector<1x32xf32> to vector<2x32xf32>
    %583 = arith.mulf %581, %582 : vector<2x32xf32>
    %cst_129 = arith.constant dense<0.000000e+00> : vector<2xf32>
    %584 = vector.multi_reduction <add>, %583, %cst_129 [1] : vector<2x32xf32> to vector<2xf32>
    %585 = vector.shape_cast %584 : vector<2xf32> to vector<2x1xf32>
    %586 = vector.broadcast %6 : vector<1x1xf32> to vector<2x1xf32>
    %587 = arith.addf %585, %586 : vector<2x1xf32>
    %588 = arith.negf %587 : vector<2x1xf32>
    %589 = math.exp %588 : vector<2x1xf32>
    %cst_130 = arith.constant 1.000000e+00 : f32
    %590 = vector.broadcast %cst_130 : f32 to vector<2x1xf32>
    %591 = arith.addf %590, %589 : vector<2x1xf32>
    %592 = arith.divf %590, %591 : vector<2x1xf32>
    %c7_i32 = arith.constant 7 : i32
    %593 = vector.broadcast %c7_i32 : i32 to vector<1x8xi32>
    %594 = arith.cmpi eq, %32, %593 : vector<1x8xi32>
    %cst_131 = arith.constant 0.000000e+00 : f32
    %595 = vector.shape_cast %594 : vector<1x8xi1> to vector<1x8xi1>
    %596 = vector.broadcast %595 : vector<1x8xi1> to vector<2x8xi1>
    %597 = vector.shape_cast %592 : vector<2x1xf32> to vector<2x1xf32>
    %598 = vector.broadcast %597 : vector<2x1xf32> to vector<2x8xf32>
    %599 = vector.broadcast %cst_131 : f32 to vector<2x8xf32>
    %600 = arith.select %596, %598, %599 : vector<2x8xi1>, vector<2x8xf32>
    %601 = arith.addf %530, %600 : vector<2x8xf32>
    %c0_132 = arith.constant 0 : index
    %c0_133 = arith.constant 0 : index
    %602 = vector.load %arg8[%c0_132, %c0_133] : memref<2x8xf32, #tpu.memory_space<vmem>>, vector<2x8xf32>
    tpu.vector_store %arg8[%c0_132, %c0_133], %601 {strides = array<i32>} : memref<2x8xf32, #tpu.memory_space<vmem>>, vector<2x8xf32>,
    %c0_134 = arith.constant 0 : index
    %c0_135 = arith.constant 0 : index
    %c0_136 = arith.constant 0 : index
    %603 = vector.load %arg9[%c0_134, %c0_135, %c0_136] : memref<2x2x32xf32, #tpu.memory_space<vmem>>, vector<1x2x32xf32>
    %604 = vector.shape_cast %603 : vector<1x2x32xf32> to vector<2x32xf32>
    %605 = vector.shape_cast %558 : vector<2x32xf32> to vector<1x2x32xf32>
    tpu.vector_store %arg9[%c0_134, %c0_135, %c0_136], %605 {strides = array<i32>} : memref<2x2x32xf32, #tpu.memory_space<vmem>>, vector<1x2x32xf32>,
    %c0_137 = arith.constant 0 : index
    %c0_138 = arith.constant 0 : index
    %c0_139 = arith.constant 0 : index
    %606 = vector.load %arg10[%c0_137, %c0_138, %c0_139] : memref<2x2x32xf32, #tpu.memory_space<vmem>>, vector<1x2x32xf32>
    %607 = vector.shape_cast %606 : vector<1x2x32xf32> to vector<2x32xf32>
    %608 = vector.shape_cast %556 : vector<2x32xf32> to vector<1x2x32xf32>
    tpu.vector_store %arg10[%c0_137, %c0_138, %c0_139], %608 {strides = array<i32>} : memref<2x2x32xf32, #tpu.memory_space<vmem>>, vector<1x2x32xf32>,
    %c1_140 = arith.constant 1 : index
    %c0_141 = arith.constant 0 : index
    %c0_142 = arith.constant 0 : index
    %609 = vector.load %arg9[%c1_140, %c0_141, %c0_142] : memref<2x2x32xf32, #tpu.memory_space<vmem>>, vector<1x2x32xf32>
    %610 = vector.shape_cast %609 : vector<1x2x32xf32> to vector<2x32xf32>
    %611 = vector.shape_cast %581 : vector<2x32xf32> to vector<1x2x32xf32>
    tpu.vector_store %arg9[%c1_140, %c0_141, %c0_142], %611 {strides = array<i32>} : memref<2x2x32xf32, #tpu.memory_space<vmem>>, vector<1x2x32xf32>,
    %c1_143 = arith.constant 1 : index
    %c0_144 = arith.constant 0 : index
    %c0_145 = arith.constant 0 : index
    %612 = vector.load %arg10[%c1_143, %c0_144, %c0_145] : memref<2x2x32xf32, #tpu.memory_space<vmem>>, vector<1x2x32xf32>
    %613 = vector.shape_cast %612 : vector<1x2x32xf32> to vector<2x32xf32>
    %614 = vector.shape_cast %579 : vector<2x32xf32> to vector<1x2x32xf32>
    tpu.vector_store %arg10[%c1_143, %c0_144, %c0_145], %614 {strides = array<i32>} : memref<2x2x32xf32, #tpu.memory_space<vmem>>, vector<1x2x32xf32>,
    return
  }
  func.func @transform_0(%arg0: i32) -> (i32, i32, i32) {
    %c0_i32 = arith.constant 0 : i32
    %c0_i32_0 = arith.constant 0 : i32
    %c0_i32_1 = arith.constant 0 : i32
    return %arg0, %c0_i32, %c0_i32_0 : i32, i32, i32
  }
  func.func @transform_1(%arg0: i32) -> (i32, i32) {
    %c0_i32 = arith.constant 0 : i32
    %c0_i32_0 = arith.constant 0 : i32
    %c0_i32_1 = arith.constant 0 : i32
    return %c0_i32, %c0_i32_0 : i32, i32
  }
  func.func @transform_2(%arg0: i32) -> (i32, i32) {
    %c0_i32 = arith.constant 0 : i32
    %c0_i32_0 = arith.constant 0 : i32
    %c0_i32_1 = arith.constant 0 : i32
    return %c0_i32, %c0_i32_0 : i32, i32
  }
  func.func @transform_3(%arg0: i32) -> (i32, i32, i32) {
    %c0_i32 = arith.constant 0 : i32
    %c0_i32_0 = arith.constant 0 : i32
    %c0_i32_1 = arith.constant 0 : i32
    %c0_i32_2 = arith.constant 0 : i32
    return %c0_i32, %c0_i32_0, %c0_i32_1 : i32, i32, i32
  }
  func.func @transform_4(%arg0: i32) -> (i32, i32, i32) {
    %c0_i32 = arith.constant 0 : i32
    %c0_i32_0 = arith.constant 0 : i32
    %c0_i32_1 = arith.constant 0 : i32
    %c0_i32_2 = arith.constant 0 : i32
    return %c0_i32, %c0_i32_0, %c0_i32_1 : i32, i32, i32
  }
  func.func @transform_5(%arg0: i32) -> (i32, i32) {
    %c0_i32 = arith.constant 0 : i32
    %c0_i32_0 = arith.constant 0 : i32
    %c0_i32_1 = arith.constant 0 : i32
    return %c0_i32, %c0_i32_0 : i32, i32
  }
  func.func @transform_6(%arg0: i32) -> (i32, i32) {
    %c0_i32 = arith.constant 0 : i32
    %c0_i32_0 = arith.constant 0 : i32
    %c0_i32_1 = arith.constant 0 : i32
    return %c0_i32, %c0_i32_0 : i32, i32
  }
  func.func @transform_7(%arg0: i32) -> (i32, i32) {
    %c0_i32 = arith.constant 0 : i32
    %c0_i32_0 = arith.constant 0 : i32
    return %c0_i32, %arg0 : i32, i32
  }
}

</mosaic_0001>

<bundles_post_ra>
// kernel: tpu_custom_call.1
= control target key start
LH: loop header
LB: loop body
LE: loop exit
PB: predicated region body
PF: predicated region fallthrough
CT: control target
= control target key end

     0   :  { %s4365_s0 = inlined_call_operand.vmem [shape: f32[8,2,40], index: 0, kind: input, shape index: {}]   ;;  %s4366_s1 = inlined_call_operand.vmem [shape: f32[40,32], index: 1, kind: input, shape index: {}]   ;;  %s4367_s2 = inlined_call_operand.vmem [shape: f32[1,32], index: 2, kind: input, shape index: {}]   ;;  %s4368_s3 = inlined_call_operand.hbm [shape: f32[2,64,128], index: 3, kind: input, shape index: {}]   ;;  %s4369_s4 = inlined_call_operand.vmem [shape: f32[2,1,128], index: 4, kind: input, shape index: {}]   ;;  %s4370_s5 = inlined_call_operand.vmem [shape: f32[1,32], index: 5, kind: input, shape index: {}]   ;;  %s4371_s6 = inlined_call_operand.<no memory space> [shape: f32[1,1], index: 6, kind: input, shape index: {}]   ;;  %s4372_s7 = inlined_call_operand.hbm [shape: f32[2,8], index: 7, kind: output, shape index: {}]  }
   0x1   :  { %v12_v0 = vstv %s4371_s6 }
   0x2   :  { %13 = vst [vmem:[#allocation4] sm:$0x1] %v12_v0 }
   0x3   :  { %14 = vsyncpa [#allocation6], 0 }
   0x4   :  { %15 = vsyncpa [#allocation7], 0  ;;  %s3417_s26 = smov [#allocation5]  }
   0x5   :  { %s27_s27 = sshll.u32 %s3417_s26, 4  ;;  %s28_s27 = int_to_ptr.vmem [resolvable:$true] %s27_s27 }
   0x6   :  { %s3381_s28 = scalar_lea.vmem %s28_s27, 2048  ;;  %p3386_p1 = scmp.lt.s32.totalorder %s28_s27, %s28_s27 }
   0x7   :  { %p3382_p0 = scmp.ne.s32.totalorder %s28_s27, %s3381_s28  ;;  %p3387_p2 = scmp.lt.s32.totalorder %s3381_s28, %s3381_s28 }
   0x9   :  { %p3388_p3 = por %p3387_p2, %p3386_p1 }
   0xb   :  { %p3389_p4 = pnand %p3388_p3, %p3382_p0 }
   0xd   :  { %3392 = shalt.err (!%p3389_p4)
}
   0xe   :  { %s3418_s29 = smov 128   ;;  %s3419_s30 = smov 8  }
   0xf   :  { %33 = dma.hbm_to_vmem [thread:$0]  %s4368_s3, 2048, %s28_s27, [#allocation6], %s3418_s29, %s3418_s29, %s3419_s30  }
  0x10   :  { %3413 = dma.done.wait [#allocation6], 2048  }
  0x11   :  { %3414 = vsyncadd [#allocation6], 4294965248  ;;  %vm47_vm0 = vcmask 254976   ;;  %v3420_v1 = vmov 0.0   ;;  %vm3421_vm1 = vmmov 0   ;;  %v3491_v2 = vld [vmem:[%s4366_s1 + $0x20] sm:$0xff]  ;;  %v80_v24 = vlaneseq }
  0x12   :  { %2832 = vmatprep.subr.mxu0 %v3420_v1  ;;  %2842 = vmatprep.mubr.msk.f32.mxu0 %vm3421_vm1, %v3420_v1  ;;  %48 = vst.msk [vmem:[#allocation2] sm:$0x3] %vm47_vm0, %v3420_v1  ;;  %49 = vst.msk [vmem:[#allocation2 + $0x2] sm:$0x3] %vm47_vm0, %v3420_v1  ;;  %v3496_v3 = vld [vmem:[%s4366_s1 + $0x18] sm:$0xff]  ;;  %v3503_v4 = vld [vmem:[%s4366_s1 + $0x10] sm:$0xff] }
  0x13   :  { %50 = vst.msk [vmem:[#allocation3] sm:$0x3] %vm47_vm0, %v3420_v1  ;;  %51 = vst.msk [vmem:[#allocation3 + $0x2] sm:$0x3] %vm47_vm0, %v3420_v1  ;;  %2845 = vmatprep.subr.mxu1 %v3420_v1  ;;  %2861 = vmatprep.mubr.msk.f32.mxu1 %vm3421_vm1, %v3420_v1  ;;  %v3505_v6 = vld [vmem:[#allocation5 + $0x38] sm:$0xff]  ;;  %s3422_s14 = smov 32  }
  0x14   :  { %2833 = vmatpush3.msra.mxu0 %v3491_v2  ;;  %v3509_v7 = vld [vmem:[#allocation5 + $0x30] sm:$0xff]  ;;  %v3515_v8 = vld [vmem:[%s4366_s1 + $0x8] sm:$0xff]  ;;  %2846 = vmatpush3.msra.mxu1 %v3505_v6  ;;  %v3520_v9 = vld [vmem:[#allocation5 + $0x28] sm:$0xff]  ;;  %vm99_vm2 = vcmask 326656   ;;  %vm177_vm3 = vcmask 261120   ;;  %vm185_vm4 = vcmask 523264  }
  0x15   :  { %2834 = vmatprep.subr.mxu0 %v3420_v1  ;;  %2847 = vmatprep.subr.mxu1 %v3420_v1  ;;  %v3526_v10 = vld [vmem:[%s4366_s1] sm:$0xff]  ;;  %v3534_v12 = vld [vmem:[#allocation5 + $0x20] sm:$0xff]  ;;  %v3554_v15 = vld [vmem:[#allocation5 + $0x8] sm:$0xff]  ;;  %v3583_v25 = vand.u32 127, %v80_v24  ;;  %v3423_v28 = vmov 0.5   ;;  %s3424_s25 = smov 64  }
  0x16   :  { %2835 = vmatpush3.msra.mxu0 %v3496_v3  ;;  %2848 = vmatpush3.msra.mxu1 %v3509_v7  ;;  %v92_v11 = vld [vmem:[%s4365_s0] sm:$0x3]  ;;  %v3558_v16 = vld [vmem:[#allocation5] sm:$0xff]  ;;  %v2605_v40 = vld [vmem:[%s4365_s0 + $0x2] sm:$0x3]  ;;  %s3425_s3 = smov 96  }
  0x17   :  { %2836 = vmatprep.subr.mxu0 %v3420_v1  ;;  %2849 = vmatprep.subr.mxu1 %v3420_v1  ;;  %v3540_v13 = vld [vmem:[#allocation5 + $0x18] sm:$0xff]  ;;  %v3545_v14 = vld [vmem:[#allocation5 + $0x10] sm:$0xff]  ;;  %vm82_vm5 = vcmp.ge.s32.totalorder %v3583_v25, 64  ;;  %vm83_vm6 = vcmp.lt.s32.totalorder %v3583_v25, 96  ;;  %v3622_v47 = vld [vmem:[#allocation5 + $0x68] sm:$0xff]  ;;  %vm431_vm8 = vcmp.eq.s32.totalorder %v3583_v25, 0 }
  0x18   :  { %2837 = vmatpush3.msra.mxu0 %v3503_v4  ;;  %2850 = vmatpush3.msra.mxu1 %v3520_v9  ;;  %v3566_v18 = vld [vmem:[%s4367_s2] ss:$0 sm:$0xff]  ;;  %vm3587_vm7 = vmand %vm82_vm5, %vm83_vm6  ;;  %v3615_v45 = vld [vmem:[#allocation5 + $0x78] sm:$0xff]  ;;  %vm734_vm9 = vcmp.eq.s32.totalorder %v3583_v25, 1  ;;  %vm1037_vm10 = vcmp.eq.s32.totalorder %v3583_v25, 2  ;;  %vm1340_vm11 = vcmp.eq.s32.totalorder %v3583_v25, 3 }
  0x19   :  { %v86_v5 = vld [vmem:[#allocation2] sm:$0x3]  ;;  %2838 = vmatprep.subr.mxu0 %v3420_v1  ;;  %2851 = vmatprep.subr.mxu1 %v3420_v1  ;;  %v3598_v29 = vsel %vm3587_vm7, 1.0, %v3423_v28  ;;  %v3628_v48 = vld [vmem:[#allocation5 + $0x60] sm:$0xff]  ;;  %v88_v51 = vld [vmem:[#allocation2 + $0x2] sm:$0x3] }
  0x1a   :  { %174 = vrot.lane.b32.xlu0 %v86_v5, %s3422_s14  ;;  %2839 = vmatpush3.msra.mxu0 %v3515_v8  ;;  %v89_v17 = vld [vmem:[#allocation3] sm:$0x3]  ;;  %v3594_v27 = vld [vmem:[%s4369_s4] ss:$0 sm:$0xff]  ;;  %v3646_v53 = vld [vmem:[#allocation5 + $0x48] sm:$0xff]  ;;  %vm1643_vm12 = vcmp.eq.s32.totalorder %v3583_v25, 4 }
  0x1b   :  { %2840 = vmatprep.subr.mxu0 %v3420_v1  ;;  %2852 = vmatpush3.msra.mxu1 %v3534_v12  ;;  %v3617_v46 = vld [vmem:[#allocation5 + $0x70] sm:$0xff]  ;;  %v3634_v50 = vld [vmem:[#allocation5 + $0x58] sm:$0xff]  ;;  %v3652_v54 = vld [vmem:[#allocation5 + $0x40] sm:$0xff]  ;;  %vm1946_vm13 = vcmp.eq.s32.totalorder %v3583_v25, 5  ;;  %vm2249_vm14 = vcmp.eq.s32.totalorder %v3583_v25, 6  ;;  %vm2552_vm15 = vcmp.eq.s32.totalorder %v3583_v25, 7 }
  0x1c   :  { %2841 = vmatpush3.msra.mxu0 %v3526_v10  ;;  %2853 = vmatprep.subr.mxu1 %v3420_v1  ;;  %v3640_v52 = vld [vmem:[#allocation5 + $0x50] sm:$0xff]  ;;  %v3705_v5 = vld [vmem:[%s4369_s4 + $0x1] ss:$0 sm:$0xff] }
  0x1d   :  { %2843 = vmatmul.mubr.msk.f32.vlgmr.msra.gmra.mxu0 %vm99_vm2, %v92_v11  ;;  %2864 = vmatprep.subr.mxu0 %v3420_v1 }
  0x1e   :  { %2854 = vmatpush3.msra.mxu1 %v3540_v13  ;;  %2880 = vmatprep.mubr.msk.f32.mxu0 %vm3421_vm1, %v3420_v1 }
  0x1f   :  { %2855 = vmatprep.subr.mxu1 %v3420_v1  ;;  %267 = vrot.lane.b32.xlu1 %v89_v17, %s3422_s14 }
  0x20   :  { %2856 = vmatpush3.msra.mxu1 %v3545_v14  ;;  %2865 = vmatpush3.msra.mxu0 %v3615_v45 }
  0x21   :  { %2857 = vmatprep.subr.mxu1 %v3420_v1  ;;  %2866 = vmatprep.subr.mxu0 %v3420_v1 }
  0x22   :  { %2858 = vmatpush3.msra.mxu1 %v3554_v15  ;;  %2867 = vmatpush3.msra.mxu0 %v3617_v46 }
  0x23   :  { %2859 = vmatprep.subr.mxu1 %v3420_v1  ;;  %2868 = vmatprep.subr.mxu0 %v3420_v1 }
  0x24   :  { %2860 = vmatpush3.msra.mxu1 %v3558_v16  ;;  %2869 = vmatpush3.msra.mxu0 %v3622_v47 }
  0x25   :  { %2883 = vmatprep.subr.mxu1 %v3420_v1  ;;  %2870 = vmatprep.subr.mxu0 %v3420_v1 }
  0x26   :  { %2871 = vmatpush3.msra.mxu0 %v3628_v48 }
  0x27   :  { %2872 = vmatprep.subr.mxu0 %v3420_v1 }
  0x28   :  { %2873 = vmatpush3.msra.mxu0 %v3634_v50 }
  0x29   :  { %2874 = vmatprep.subr.mxu0 %v3420_v1 }
  0x2a   :  { %2875 = vmatpush3.msra.mxu0 %v3640_v52 }
  0x2b   :  { %2876 = vmatprep.subr.mxu0 %v3420_v1 }
  0x2c   :  { %2877 = vmatpush3.msra.mxu0 %v3646_v53 }
  0x2d   :  { %2878 = vmatprep.subr.mxu0 %v3420_v1 }
  0x2e   :  { %2879 = vmatpush3.msra.mxu0 %v3652_v54 }
  0x2f   :  { %2896 = vmatprep.subr.mxu0 %v3420_v1 }
  0x8c   :  { %v175_v20 = vpop.permute.xlu0 %174 }
  0x91   :  { %v268_v41 = vpop.permute.xlu1 %267 }
  0xdd   :  { %v169_v19 = vpop.f32.mrf.mxu0 }
  0xde   :  { %v170_v21 = vadd.f32 %v3566_v18, %v169_v19 }
  0xdf   :  { %v2844_v22 = vpop.f32.mrf.mxu0 }
  0xe0   :  { %v178_v23 = vsel %vm177_vm3, %v170_v21, %v175_v20 }
  0xe1   :  { %2862 = vmatmul.mubr.msk.f32.vlgmr.msra.gmra.mxu1 %vm185_vm4, %v178_v23 }
  0xe2   :  { %2884 = vmatpush3.msra.mxu1 %v3491_v2  ;;  %2893 = vmatprep.mubr.msk.f32.mxu1 %vm3421_vm1, %v3420_v1 }
  0xe3   :  { %2885 = vmatprep.subr.mxu1 %v3420_v1 }
  0xe4   :  { %2886 = vmatpush3.msra.mxu1 %v3496_v3 }
  0xe5   :  { %2887 = vmatprep.subr.mxu1 %v3420_v1 }
  0xe6   :  { %2888 = vmatpush3.msra.mxu1 %v3503_v4 }
  0xe7   :  { %2889 = vmatprep.subr.mxu1 %v3420_v1 }
  0xe8   :  { %2890 = vmatpush3.msra.mxu1 %v3515_v8 }
  0xe9   :  { %2891 = vmatprep.subr.mxu1 %v3420_v1 }
  0xea   :  { %2892 = vmatpush3.msra.mxu1 %v3526_v10 }
  0xeb   :  { %2915 = vmatprep.subr.mxu1 %v3420_v1  ;;  %2894 = vmatmul.mubr.msk.f32.vlgmr.msra.gmra.mxu1 %vm99_vm2, %v2605_v40 }
  0xec   :  { %2931 = vmatprep.mubr.msk.f32.mxu1 %vm3421_vm1, %v3420_v1  ;;  %2916 = vmatpush3.msra.mxu1 %v3615_v45 }
  0xed   :  { %2917 = vmatprep.subr.mxu1 %v3420_v1 }
  0xee   :  { %2918 = vmatpush3.msra.mxu1 %v3617_v46 }
  0xef   :  { %2919 = vmatprep.subr.mxu1 %v3420_v1 }
  0xf0   :  { %2920 = vmatpush3.msra.mxu1 %v3622_v47 }
  0xf1   :  { %2921 = vmatprep.subr.mxu1 %v3420_v1 }
  0xf2   :  { %2922 = vmatpush3.msra.mxu1 %v3628_v48 }
  0xf3   :  { %2923 = vmatprep.subr.mxu1 %v3420_v1 }
  0xf4   :  { %2924 = vmatpush3.msra.mxu1 %v3634_v50 }
  0xf5   :  { %2925 = vmatprep.subr.mxu1 %v3420_v1 }
  0xf6   :  { %2926 = vmatpush3.msra.mxu1 %v3640_v52 }
  0xf7   :  { %2927 = vmatprep.subr.mxu1 %v3420_v1 }
  0xf8   :  { %2928 = vmatpush3.msra.mxu1 %v3646_v53 }
  0xf9   :  { %2929 = vmatprep.subr.mxu1 %v3420_v1 }
  0xfa   :  { %2930 = vmatpush3.msra.mxu1 %v3652_v54 }
  0xfb   :  { %2947 = vmatprep.subr.mxu1 %v3420_v1 }
 0x1a1   :  { %v255_v30 = vpop.f32.mrf.mxu1 }
 0x1a2   :  { %v256_v31 = vadd.f32 %v3594_v27, %v255_v30 }
 0x1a3   :  { %v2863_v32 = vpop.f32.mrf.mxu1 }
 0x1a4   :  { %v259_v33 = vmul.f32 %v256_v31, %v3598_v29 }
 0x1a6   :  { %3253 = vtanh.f32 %v259_v33  ;;  %v91_v33 = vld [vmem:[#allocation3 + $0x2] sm:$0x3] }
 0x1ab   :  { %v512_v55 = vpop.f32.mrf.mxu1 }
 0x1ac   :  { %v513_v62 = vadd.f32 %v3566_v18, %v512_v55 }
 0x1ad   :  { %v2895_v56 = vpop.f32.mrf.mxu1 }
 0x1b3   :  { %v3254_v34 = vpop.eup %3253 }
 0x1b4   :  { %v261_v35 = vmul.f32 0.5, %v3254_v34 }
 0x1b6   :  { %v262_v36 = vadd.f32 0.5, %v261_v35 }
 0x1b8   :  { %v265_v37 = vsel %vm3587_vm7, %v3254_v34, %v262_v36 }
 0x1b9   :  { %272 = vrot.lane.b32.xlu0 %v265_v37, %s3424_s25  ;;  %v270_v42 = vmul.f32 %v268_v41, %v265_v37 }
 0x22b   :  { %v273_v38 = vpop.permute.xlu0 %272 }
 0x22c   :  { %v275_v39 = vmul.f32 %v273_v38, %v265_v37 }
 0x22e   :  { %277 = vrot.lane.b32.xlu1 %v275_v39, %s3422_s14 }
 0x2a0   :  { %v278_v43 = vpop.permute.xlu1 %277 }
 0x2a1   :  { %v3612_v44 = vadd.f32 %v278_v43, %v270_v42  ;;  %v2610_v42 = vld [vmem:[%s4365_s0 + $0x4] sm:$0x3] }
 0x2a3   :  { %3255 = vtanh.f32 %v3612_v44 }
 0x2b0   :  { %v3256_v49 = vpop.eup %3255 }
 0x2b1   :  { %283 = vrot.lane.b32.xlu0 %v3256_v49, %s3424_s25 }
 0x2b5   :  { %292 = vrot.lane.b32.xlu0 %v88_v51, %s3422_s14 }
 0x323   :  { %v284_v57 = vpop.permute.xlu0 %283 }
 0x324   :  { %v286_v58 = vmul.f32 %v284_v57, %v265_v37 }
 0x326   :  { %288 = vrot.lane.b32.xlu1 %v286_v58, %s3422_s14 }
 0x327   :  { %v293_v59 = vpop.permute.xlu0 %292 }
 0x32a   :  { %516 = vrot.lane.b32.xlu1 %v286_v58, %s3424_s25 }
 0x398   :  { %v289_v60 = vpop.permute.xlu1 %288 }
 0x399   :  { %v295_v61 = vsel %vm177_vm3, %v289_v60, %v293_v59 }
 0x39a   :  { %2881 = vmatmul.mubr.msk.f32.vlgmr.msra.gmra.mxu0 %vm185_vm4, %v295_v61 }
 0x39b   :  { %2897 = vmatpush3.msra.mxu0 %v3505_v6  ;;  %2912 = vmatprep.mubr.msk.f32.mxu0 %vm3421_vm1, %v3420_v1 }
 0x39c   :  { %2898 = vmatprep.subr.mxu0 %v3420_v1  ;;  %v517_v63 = vpop.permute.xlu1 %516 }
 0x39d   :  { %2899 = vmatpush3.msra.mxu0 %v3509_v7  ;;  %v519_v0 = vsel %vm177_vm3, %v513_v62, %v517_v63 }
 0x39e   :  { %2900 = vmatprep.subr.mxu0 %v3420_v1 }
 0x39f   :  { %2901 = vmatpush3.msra.mxu0 %v3520_v9 }
 0x3a0   :  { %2902 = vmatprep.subr.mxu0 %v3420_v1 }
 0x3a1   :  { %2903 = vmatpush3.msra.mxu0 %v3534_v12 }
 0x3a2   :  { %2904 = vmatprep.subr.mxu0 %v3420_v1 }
 0x3a3   :  { %2905 = vmatpush3.msra.mxu0 %v3540_v13 }
 0x3a4   :  { %2906 = vmatprep.subr.mxu0 %v3420_v1 }
 0x3a5   :  { %2907 = vmatpush3.msra.mxu0 %v3545_v14 }
 0x3a6   :  { %2908 = vmatprep.subr.mxu0 %v3420_v1 }
 0x3a7   :  { %2909 = vmatpush3.msra.mxu0 %v3554_v15 }
 0x3a8   :  { %2910 = vmatprep.subr.mxu0 %v3420_v1 }
 0x3a9   :  { %2911 = vmatpush3.msra.mxu0 %v3558_v16 }
 0x3aa   :  { %2913 = vmatmul.mubr.msk.f32.vlgmr.msra.gmra.mxu0 %vm185_vm4, %v519_v0  ;;  %2934 = vmatprep.subr.mxu0 %v3420_v1 }
 0x3ab   :  { %2935 = vmatpush3.msra.mxu0 %v3491_v2  ;;  %2944 = vmatprep.mubr.msk.f32.mxu0 %vm3421_vm1, %v3420_v1 }
 0x3ac   :  { %2936 = vmatprep.subr.mxu0 %v3420_v1 }
 0x3ad   :  { %2937 = vmatpush3.msra.mxu0 %v3496_v3 }
 0x3ae   :  { %2938 = vmatprep.subr.mxu0 %v3420_v1 }
 0x3af   :  { %2939 = vmatpush3.msra.mxu0 %v3503_v4 }
 0x3b0   :  { %2940 = vmatprep.subr.mxu0 %v3420_v1 }
 0x3b1   :  { %2941 = vmatpush3.msra.mxu0 %v3515_v8 }
 0x3b2   :  { %2942 = vmatprep.subr.mxu0 %v3420_v1 }
 0x3b3   :  { %2943 = vmatpush3.msra.mxu0 %v3526_v10 }
 0x3b4   :  { %2966 = vmatprep.subr.mxu0 %v3420_v1  ;;  %2945 = vmatmul.mubr.msk.f32.vlgmr.msra.gmra.mxu0 %vm99_vm2, %v2610_v42 }
 0x3b5   :  { %2967 = vmatpush3.msra.mxu0 %v3615_v45  ;;  %2982 = vmatprep.mubr.msk.f32.mxu0 %vm3421_vm1, %v3420_v1 }
 0x3b6   :  { %2968 = vmatprep.subr.mxu0 %v3420_v1 }
 0x3b7   :  { %2969 = vmatpush3.msra.mxu0 %v3617_v46 }
 0x3b8   :  { %2970 = vmatprep.subr.mxu0 %v3420_v1 }
 0x3b9   :  { %2971 = vmatpush3.msra.mxu0 %v3622_v47 }
 0x3ba   :  { %2972 = vmatprep.subr.mxu0 %v3420_v1 }
 0x3bb   :  { %2973 = vmatpush3.msra.mxu0 %v3628_v48 }
 0x3bc   :  { %2974 = vmatprep.subr.mxu0 %v3420_v1 }
 0x3bd   :  { %2975 = vmatpush3.msra.mxu0 %v3634_v50 }
 0x3be   :  { %2976 = vmatprep.subr.mxu0 %v3420_v1 }
 0x3bf   :  { %2977 = vmatpush3.msra.mxu0 %v3640_v52 }
 0x3c0   :  { %2978 = vmatprep.subr.mxu0 %v3420_v1 }
 0x3c1   :  { %2979 = vmatpush3.msra.mxu0 %v3646_v53 }
 0x3c2   :  { %2980 = vmatprep.subr.mxu0 %v3420_v1 }
 0x3c3   :  { %2981 = vmatpush3.msra.mxu0 %v3652_v54 }
 0x3c4   :  { %2998 = vmatprep.subr.mxu0 %v3420_v1 }
 0x45a   :  { %v371_v11 = vpop.f32.mrf.mxu0 }
 0x45b   :  { %v372_v17 = vadd.f32 %v3705_v5, %v371_v11 }
 0x45c   :  { %v2882_v19 = vpop.f32.mrf.mxu0 }
 0x45d   :  { %v375_v20 = vmul.f32 %v372_v17, %v3598_v29 }
 0x45f   :  { %3257 = vtanh.f32 %v375_v20 }
 0x46a   :  { %v589_v21 = vpop.f32.mrf.mxu0 }
 0x46b   :  { %v590_v22 = vadd.f32 %v3594_v27, %v589_v21 }
 0x46c   :  { %v3258_v23 = vpop.eup %3257  ;;  %v2914_v24 = vpop.f32.mrf.mxu0 }
 0x46d   :  { %v593_v28 = vmul.f32 %v590_v22, %v3598_v29  ;;  %v377_v30 = vmul.f32 0.5, %v3258_v23 }
 0x46f   :  { %3259 = vtanh.f32 %v593_v28  ;;  %v378_v31 = vadd.f32 0.5, %v377_v30 }
 0x471   :  { %v379_v32 = vsel %vm3587_vm7, %v3258_v23, %v378_v31 }
 0x472   :  { %386 = vrot.lane.b32.xlu0 %v379_v32, %s3424_s25 }
 0x474   :  { %v815_v63 = vpop.f32.mrf.mxu0 }
 0x475   :  { %v816_v21 = vadd.f32 %v3566_v18, %v815_v63 }
 0x476   :  { %381 = vrot.lane.b32.xlu0 %v91_v33, %s3422_s14  ;;  %v2946_v0 = vpop.f32.mrf.mxu0 }
 0x47c   :  { %v3260_v34 = vpop.eup %3259 }
 0x47d   :  { %v595_v35 = vmul.f32 0.5, %v3260_v34 }
 0x47f   :  { %v596_v36 = vadd.f32 0.5, %v595_v35 }
 0x481   :  { %v597_v37 = vsel %vm3587_vm7, %v3260_v34, %v596_v36 }
 0x482   :  { %600 = vrot.lane.b32.xlu1 %v597_v37, %s3424_s25  ;;  %v598_v56 = vmul.f32 %v597_v37, %v3612_v44 }
 0x4e4   :  { %v387_v38 = vpop.permute.xlu0 %386 }
 0x4e5   :  { %v389_v39 = vmul.f32 %v387_v38, %v379_v32 }
 0x4e7   :  { %391 = vrot.lane.b32.xlu1 %v389_v39, %s3422_s14 }
 0x4e8   :  { %v382_v43 = vpop.permute.xlu0 %381 }
 0x4e9   :  { %v384_v49 = vmul.f32 %v382_v43, %v379_v32 }
 0x4f4   :  { %v601_v40 = vpop.permute.xlu1 %600 }
 0x4f5   :  { %v603_v41 = vmul.f32 %v601_v40, %v597_v37 }
 0x4f7   :  { %605 = vrot.lane.b32.xlu0 %v603_v41, %s3422_s14 }
 0x559   :  { %v392_v51 = vpop.permute.xlu1 %391 }
 0x55a   :  { %v3742_v55 = vadd.f32 %v392_v51, %v384_v49 }
 0x55c   :  { %3261 = vtanh.f32 %v3742_v55 }
 0x569   :  { %v3262_v57 = vpop.eup %3261  ;;  %v606_v58 = vpop.permute.xlu0 %605 }
 0x56a   :  { %v3746_v59 = vadd.f32 %v606_v58, %v598_v56  ;;  %397 = vrot.lane.b32.xlu1 %v3262_v57, %s3424_s25  ;;  %v2615_v58 = vld [vmem:[%s4365_s0 + $0x6] sm:$0x3] }
 0x56c   :  { %3263 = vtanh.f32 %v3746_v59 }
 0x579   :  { %v3264_v60 = vpop.eup %3263 }
 0x57a   :  { %611 = vrot.lane.b32.xlu0 %v3264_v60, %s3424_s25 }
 0x5dc   :  { %v398_v61 = vpop.permute.xlu1 %397 }
 0x5dd   :  { %v3751_v62 = vmul.f32 %v398_v61, %v379_v32 }
 0x5df   :  { %620 = vrot.lane.b32.xlu0 %v3751_v62, %s3424_s25 }
 0x5ec   :  { %v612_v44 = vpop.permute.xlu0 %611 }
 0x5ed   :  { %v614_v11 = vmul.f32 %v612_v44, %v597_v37 }
 0x5ef   :  { %616 = vrot.lane.b32.xlu1 %v614_v11, %s3422_s14 }
 0x5f3   :  { %819 = vrot.lane.b32.xlu1 %v614_v11, %s3424_s25 }
 0x651   :  { %v621_v17 = vpop.permute.xlu0 %620 }
 0x661   :  { %v617_v19 = vpop.permute.xlu1 %616 }
 0x662   :  { %v623_v20 = vsel %vm177_vm3, %v617_v19, %v621_v17 }
 0x663   :  { %2932 = vmatmul.mubr.msk.f32.vlgmr.msra.gmra.mxu1 %vm185_vm4, %v623_v20 }
 0x664   :  { %2948 = vmatpush3.msra.mxu1 %v3505_v6  ;;  %2963 = vmatprep.mubr.msk.f32.mxu1 %vm3421_vm1, %v3420_v1 }
 0x665   :  { %2949 = vmatprep.subr.mxu1 %v3420_v1  ;;  %v820_v22 = vpop.permute.xlu1 %819 }
 0x666   :  { %2950 = vmatpush3.msra.mxu1 %v3509_v7  ;;  %v822_v23 = vsel %vm177_vm3, %v816_v21, %v820_v22 }
 0x667   :  { %2951 = vmatprep.subr.mxu1 %v3420_v1 }
 0x668   :  { %2952 = vmatpush3.msra.mxu1 %v3520_v9 }
 0x669   :  { %2953 = vmatprep.subr.mxu1 %v3420_v1 }
 0x66a   :  { %2954 = vmatpush3.msra.mxu1 %v3534_v12 }
 0x66b   :  { %2955 = vmatprep.subr.mxu1 %v3420_v1 }
 0x66c   :  { %2956 = vmatpush3.msra.mxu1 %v3540_v13 }
 0x66d   :  { %2957 = vmatprep.subr.mxu1 %v3420_v1 }
 0x66e   :  { %2958 = vmatpush3.msra.mxu1 %v3545_v14 }
 0x66f   :  { %2959 = vmatprep.subr.mxu1 %v3420_v1 }
 0x670   :  { %2960 = vmatpush3.msra.mxu1 %v3554_v15 }
 0x671   :  { %2961 = vmatprep.subr.mxu1 %v3420_v1 }
 0x672   :  { %2962 = vmatpush3.msra.mxu1 %v3558_v16 }
 0x673   :  { %2964 = vmatmul.mubr.msk.f32.vlgmr.msra.gmra.mxu1 %vm185_vm4, %v822_v23  ;;  %2985 = vmatprep.subr.mxu1 %v3420_v1 }
 0x674   :  { %2986 = vmatpush3.msra.mxu1 %v3491_v2  ;;  %2995 = vmatprep.mubr.msk.f32.mxu1 %vm3421_vm1, %v3420_v1 }
 0x675   :  { %2987 = vmatprep.subr.mxu1 %v3420_v1 }
 0x676   :  { %2988 = vmatpush3.msra.mxu1 %v3496_v3 }
 0x677   :  { %2989 = vmatprep.subr.mxu1 %v3420_v1 }
 0x678   :  { %2990 = vmatpush3.msra.mxu1 %v3503_v4 }
 0x679   :  { %2991 = vmatprep.subr.mxu1 %v3420_v1 }
 0x67a   :  { %2992 = vmatpush3.msra.mxu1 %v3515_v8 }
 0x67b   :  { %2993 = vmatprep.subr.mxu1 %v3420_v1 }
 0x67c   :  { %2994 = vmatpush3.msra.mxu1 %v3526_v10 }
 0x67d   :  { %3017 = vmatprep.subr.mxu1 %v3420_v1  ;;  %2996 = vmatmul.mubr.msk.f32.vlgmr.msra.gmra.mxu1 %vm99_vm2, %v2615_v58 }
 0x67e   :  { %3018 = vmatpush3.msra.mxu1 %v3615_v45  ;;  %3033 = vmatprep.mubr.msk.f32.mxu1 %vm3421_vm1, %v3420_v1 }
 0x67f   :  { %3019 = vmatprep.subr.mxu1 %v3420_v1 }
 0x680   :  { %3020 = vmatpush3.msra.mxu1 %v3617_v46 }
 0x681   :  { %3021 = vmatprep.subr.mxu1 %v3420_v1 }
 0x682   :  { %3022 = vmatpush3.msra.mxu1 %v3622_v47 }
 0x683   :  { %3023 = vmatprep.subr.mxu1 %v3420_v1 }
 0x684   :  { %3024 = vmatpush3.msra.mxu1 %v3628_v48 }
 0x685   :  { %3025 = vmatprep.subr.mxu1 %v3420_v1 }
 0x686   :  { %3026 = vmatpush3.msra.mxu1 %v3634_v50 }
 0x687   :  { %3027 = vmatprep.subr.mxu1 %v3420_v1 }
 0x688   :  { %3028 = vmatpush3.msra.mxu1 %v3640_v52 }
 0x689   :  { %3029 = vmatprep.subr.mxu1 %v3420_v1 }
 0x68a   :  { %3030 = vmatpush3.msra.mxu1 %v3646_v53 }
 0x68b   :  { %3031 = vmatprep.subr.mxu1 %v3420_v1 }
 0x68c   :  { %3032 = vmatpush3.msra.mxu1 %v3652_v54 }
 0x68d   :  { %3049 = vmatprep.subr.mxu1 %v3420_v1 }
 0x723   :  { %v693_v24 = vpop.f32.mrf.mxu1 }
 0x724   :  { %v694_v28 = vadd.f32 %v3705_v5, %v693_v24 }
 0x725   :  { %v2933_v30 = vpop.f32.mrf.mxu1 }
 0x726   :  { %v697_v31 = vmul.f32 %v694_v28, %v3598_v29 }
 0x728   :  { %3265 = vtanh.f32 %v697_v31 }
 0x733   :  { %v892_v32 = vpop.f32.mrf.mxu1 }
 0x734   :  { %v893_v33 = vadd.f32 %v3594_v27, %v892_v32 }
 0x735   :  { %v3266_v34 = vpop.eup %3265  ;;  %v2965_v35 = vpop.f32.mrf.mxu1 }
 0x736   :  { %v896_v36 = vmul.f32 %v893_v33, %v3598_v29  ;;  %v699_v37 = vmul.f32 0.5, %v3266_v34 }
 0x738   :  { %3267 = vtanh.f32 %v896_v36  ;;  %v700_v38 = vadd.f32 0.5, %v699_v37 }
 0x73a   :  { %v701_v39 = vsel %vm3587_vm7, %v3266_v34, %v700_v38 }
 0x73b   :  { %704 = vrot.lane.b32.xlu0 %v701_v39, %s3424_s25  ;;  %v702_v60 = vmul.f32 %v701_v39, %v3742_v55 }
 0x73d   :  { %v1118_v21 = vpop.f32.mrf.mxu1 }
 0x73e   :  { %v1119_v31 = vadd.f32 %v3566_v18, %v1118_v21 }
 0x73f   :  { %v2997_v22 = vpop.f32.mrf.mxu1 }
 0x745   :  { %v3268_v40 = vpop.eup %3267 }
 0x746   :  { %v898_v41 = vmul.f32 0.5, %v3268_v40 }
 0x748   :  { %v899_v42 = vadd.f32 0.5, %v898_v41 }
 0x74a   :  { %v900_v43 = vsel %vm3587_vm7, %v3268_v40, %v899_v42 }
 0x74b   :  { %903 = vrot.lane.b32.xlu1 %v900_v43, %s3424_s25  ;;  %v901_v0 = vmul.f32 %v900_v43, %v3746_v59 }
 0x7ad   :  { %v705_v49 = vpop.permute.xlu0 %704 }
 0x7ae   :  { %v707_v51 = vmul.f32 %v705_v49, %v701_v39 }
 0x7b0   :  { %709 = vrot.lane.b32.xlu0 %v707_v51, %s3422_s14 }
 0x7bd   :  { %v904_v56 = vpop.permute.xlu1 %903 }
 0x7be   :  { %v906_v57 = vmul.f32 %v904_v56, %v900_v43 }
 0x7c0   :  { %908 = vrot.lane.b32.xlu1 %v906_v57, %s3422_s14 }
 0x822   :  { %v710_v61 = vpop.permute.xlu0 %709 }
 0x823   :  { %v3827_v63 = vadd.f32 %v710_v61, %v702_v60 }
 0x825   :  { %3269 = vtanh.f32 %v3827_v63 }
 0x832   :  { %v3270_v44 = vpop.eup %3269  ;;  %v909_v11 = vpop.permute.xlu1 %908 }
 0x833   :  { %v3831_v17 = vadd.f32 %v909_v11, %v901_v0  ;;  %715 = vrot.lane.b32.xlu0 %v3270_v44, %s3424_s25 }
 0x835   :  { %3271 = vtanh.f32 %v3831_v17 }
 0x842   :  { %v3272_v19 = vpop.eup %3271 }
 0x843   :  { %914 = vrot.lane.b32.xlu1 %v3272_v19, %s3424_s25  ;;  %v2620_v19 = vld [vmem:[%s4365_s0 + $0x8] sm:$0x3] }
 0x8a5   :  { %v716_v20 = vpop.permute.xlu0 %715 }
 0x8a6   :  { %v3836_v55 = vmul.f32 %v716_v20, %v701_v39 }
 0x8a8   :  { %923 = vrot.lane.b32.xlu1 %v3836_v55, %s3424_s25 }
 0x8b5   :  { %v915_v59 = vpop.permute.xlu1 %914 }
 0x8b6   :  { %v917_v23 = vmul.f32 %v915_v59, %v900_v43 }
 0x8b8   :  { %919 = vrot.lane.b32.xlu0 %v917_v23, %s3422_s14 }
 0x8bc   :  { %1122 = vrot.lane.b32.xlu0 %v917_v23, %s3424_s25 }
 0x91a   :  { %v924_v24 = vpop.permute.xlu1 %923 }
 0x92a   :  { %v920_v28 = vpop.permute.xlu0 %919 }
 0x92b   :  { %v926_v30 = vsel %vm177_vm3, %v920_v28, %v924_v24 }
 0x92c   :  { %2983 = vmatmul.mubr.msk.f32.vlgmr.msra.gmra.mxu0 %vm185_vm4, %v926_v30 }
 0x92d   :  { %2999 = vmatpush3.msra.mxu0 %v3505_v6  ;;  %3014 = vmatprep.mubr.msk.f32.mxu0 %vm3421_vm1, %v3420_v1 }
 0x92e   :  { %3000 = vmatprep.subr.mxu0 %v3420_v1  ;;  %v1123_v32 = vpop.permute.xlu0 %1122 }
 0x92f   :  { %3001 = vmatpush3.msra.mxu0 %v3509_v7  ;;  %v1125_v33 = vsel %vm177_vm3, %v1119_v31, %v1123_v32 }
 0x930   :  { %3002 = vmatprep.subr.mxu0 %v3420_v1 }
 0x931   :  { %3003 = vmatpush3.msra.mxu0 %v3520_v9 }
 0x932   :  { %3004 = vmatprep.subr.mxu0 %v3420_v1 }
 0x933   :  { %3005 = vmatpush3.msra.mxu0 %v3534_v12 }
 0x934   :  { %3006 = vmatprep.subr.mxu0 %v3420_v1 }
 0x935   :  { %3007 = vmatpush3.msra.mxu0 %v3540_v13 }
 0x936   :  { %3008 = vmatprep.subr.mxu0 %v3420_v1 }
 0x937   :  { %3009 = vmatpush3.msra.mxu0 %v3545_v14 }
 0x938   :  { %3010 = vmatprep.subr.mxu0 %v3420_v1 }
 0x939   :  { %3011 = vmatpush3.msra.mxu0 %v3554_v15 }
 0x93a   :  { %3012 = vmatprep.subr.mxu0 %v3420_v1 }
 0x93b   :  { %3013 = vmatpush3.msra.mxu0 %v3558_v16 }
 0x93c   :  { %3015 = vmatmul.mubr.msk.f32.vlgmr.msra.gmra.mxu0 %vm185_vm4, %v1125_v33  ;;  %3036 = vmatprep.subr.mxu0 %v3420_v1 }
 0x93d   :  { %3037 = vmatpush3.msra.mxu0 %v3491_v2  ;;  %3046 = vmatprep.mubr.msk.f32.mxu0 %vm3421_vm1, %v3420_v1 }
 0x93e   :  { %3038 = vmatprep.subr.mxu0 %v3420_v1 }
 0x93f   :  { %3039 = vmatpush3.msra.mxu0 %v3496_v3 }
 0x940   :  { %3040 = vmatprep.subr.mxu0 %v3420_v1 }
 0x941   :  { %3041 = vmatpush3.msra.mxu0 %v3503_v4 }
 0x942   :  { %3042 = vmatprep.subr.mxu0 %v3420_v1 }
 0x943   :  { %3043 = vmatpush3.msra.mxu0 %v3515_v8 }
 0x944   :  { %3044 = vmatprep.subr.mxu0 %v3420_v1 }
 0x945   :  { %3045 = vmatpush3.msra.mxu0 %v3526_v10 }
 0x946   :  { %3068 = vmatprep.subr.mxu0 %v3420_v1  ;;  %3047 = vmatmul.mubr.msk.f32.vlgmr.msra.gmra.mxu0 %vm99_vm2, %v2620_v19 }
 0x947   :  { %3069 = vmatpush3.msra.mxu0 %v3615_v45  ;;  %3084 = vmatprep.mubr.msk.f32.mxu0 %vm3421_vm1, %v3420_v1 }
 0x948   :  { %3070 = vmatprep.subr.mxu0 %v3420_v1 }
 0x949   :  { %3071 = vmatpush3.msra.mxu0 %v3617_v46 }
 0x94a   :  { %3072 = vmatprep.subr.mxu0 %v3420_v1 }
 0x94b   :  { %3073 = vmatpush3.msra.mxu0 %v3622_v47 }
 0x94c   :  { %3074 = vmatprep.subr.mxu0 %v3420_v1 }
 0x94d   :  { %3075 = vmatpush3.msra.mxu0 %v3628_v48 }
 0x94e   :  { %3076 = vmatprep.subr.mxu0 %v3420_v1 }
 0x94f   :  { %3077 = vmatpush3.msra.mxu0 %v3634_v50 }
 0x950   :  { %3078 = vmatprep.subr.mxu0 %v3420_v1 }
 0x951   :  { %3079 = vmatpush3.msra.mxu0 %v3640_v52 }
 0x952   :  { %3080 = vmatprep.subr.mxu0 %v3420_v1 }
 0x953   :  { %3081 = vmatpush3.msra.mxu0 %v3646_v53 }
 0x954   :  { %3082 = vmatprep.subr.mxu0 %v3420_v1 }
 0x955   :  { %3083 = vmatpush3.msra.mxu0 %v3652_v54 }
 0x956   :  { %3100 = vmatprep.subr.mxu0 %v3420_v1 }
 0x9ec   :  { %v996_v34 = vpop.f32.mrf.mxu0 }
 0x9ed   :  { %v997_v35 = vadd.f32 %v3705_v5, %v996_v34 }
 0x9ee   :  { %v2984_v36 = vpop.f32.mrf.mxu0 }
 0x9ef   :  { %v1000_v37 = vmul.f32 %v997_v35, %v3598_v29 }
 0x9f1   :  { %3273 = vtanh.f32 %v1000_v37 }
 0x9fc   :  { %v1195_v38 = vpop.f32.mrf.mxu0 }
 0x9fd   :  { %v1196_v39 = vadd.f32 %v3594_v27, %v1195_v38 }
 0x9fe   :  { %v3274_v40 = vpop.eup %3273  ;;  %v3016_v41 = vpop.f32.mrf.mxu0 }
 0x9ff   :  { %v1199_v42 = vmul.f32 %v1196_v39, %v3598_v29  ;;  %v1002_v43 = vmul.f32 0.5, %v3274_v40 }
 0xa01   :  { %3275 = vtanh.f32 %v1199_v42  ;;  %v1003_v49 = vadd.f32 0.5, %v1002_v43 }
 0xa03   :  { %v1004_v51 = vsel %vm3587_vm7, %v3274_v40, %v1003_v49 }
 0xa04   :  { %1007 = vrot.lane.b32.xlu1 %v1004_v51, %s3424_s25  ;;  %v1005_v20 = vmul.f32 %v1004_v51, %v3827_v63 }
 0xa06   :  { %v1421_v32 = vpop.f32.mrf.mxu0 }
 0xa08   :  { %v3048_v33 = vpop.f32.mrf.mxu0 }
 0xa0e   :  { %v3276_v56 = vpop.eup %3275 }
 0xa0f   :  { %v1201_v57 = vmul.f32 0.5, %v3276_v56 }
 0xa11   :  { %v1202_v58 = vadd.f32 0.5, %v1201_v57 }
 0xa13   :  { %v1203_v60 = vsel %vm3587_vm7, %v3276_v56, %v1202_v58  ;;  %v2625_v56 = vld [vmem:[%s4365_s0 + $0xa] sm:$0x3] }
 0xa14   :  { %1206 = vrot.lane.b32.xlu0 %v1203_v60, %s3424_s25  ;;  %v1204_v59 = vmul.f32 %v1203_v60, %v3831_v17 }
 0xa76   :  { %v1008_v61 = vpop.permute.xlu1 %1007 }
 0xa77   :  { %v1010_v0 = vmul.f32 %v1008_v61, %v1004_v51 }
 0xa79   :  { %1012 = vrot.lane.b32.xlu1 %v1010_v0, %s3422_s14 }
 0xa86   :  { %v1207_v44 = vpop.permute.xlu0 %1206 }
 0xa87   :  { %v1209_v11 = vmul.f32 %v1207_v44, %v1203_v60 }
 0xa89   :  { %1211 = vrot.lane.b32.xlu0 %v1209_v11, %s3422_s14 }
 0xaeb   :  { %v1013_v21 = vpop.permute.xlu1 %1012 }
 0xaec   :  { %v3912_v22 = vadd.f32 %v1013_v21, %v1005_v20 }
 0xaee   :  { %3277 = vtanh.f32 %v3912_v22 }
 0xafb   :  { %v3278_v23 = vpop.eup %3277  ;;  %v1212_v24 = vpop.permute.xlu0 %1211 }
 0xafc   :  { %v3916_v28 = vadd.f32 %v1212_v24, %v1204_v59  ;;  %1018 = vrot.lane.b32.xlu1 %v3278_v23, %s3424_s25  ;;  %v4020_v59 = vld [vmem:[#allocation5 + $0x30] sm:$0xff]  ;;  %v4024_v23 = vld [vmem:[#allocation5 + $0x28] sm:$0xff]  ;;  %v4028_v24 = vld [vmem:[#allocation5 + $0x20] sm:$0xff] }
 0xafe   :  { %3279 = vtanh.f32 %v3916_v28 }
 0xb0b   :  { %v3280_v30 = vpop.eup %3279 }
 0xb0c   :  { %1217 = vrot.lane.b32.xlu0 %v3280_v30, %s3424_s25  ;;  %v4039_v30 = vld [vmem:[%s4367_s2] ss:$0 sm:$0xff] }
 0xb6e   :  { %v1019_v31 = vpop.permute.xlu1 %1018 }
 0xb6f   :  { %v3921_v63 = vmul.f32 %v1019_v31, %v1004_v51 }
 0xb71   :  { %1226 = vrot.lane.b32.xlu0 %v3921_v63, %s3424_s25 }
 0xb7e   :  { %v1218_v17 = vpop.permute.xlu0 %1217 }
 0xb7f   :  { %v1220_v34 = vmul.f32 %v1218_v17, %v1203_v60  ;;  %v4046_v17 = vld [vmem:[#allocation5 + $0x8] sm:$0xff] }
 0xb81   :  { %1222 = vrot.lane.b32.xlu1 %v1220_v34, %s3422_s14 }
 0xb85   :  { %1425 = vrot.lane.b32.xlu1 %v1220_v34, %s3424_s25 }
 0xbe3   :  { %v1227_v35 = vpop.permute.xlu0 %1226 }
 0xbf3   :  { %v1223_v36 = vpop.permute.xlu1 %1222 }
 0xbf4   :  { %v1229_v37 = vsel %vm177_vm3, %v1223_v36, %v1227_v35  ;;  %v4051_v35 = vld [vmem:[#allocation5] sm:$0xff]  ;;  %v4059_v36 = vld [vmem:[%s4366_s1 + $0x20] sm:$0xff] }
 0xbf5   :  { %3034 = vmatmul.mubr.msk.f32.vlgmr.msra.gmra.mxu1 %vm185_vm4, %v1229_v37  ;;  %v4068_v37 = vld [vmem:[%s4366_s1 + $0x18] sm:$0xff] }
 0xbf6   :  { %3050 = vmatpush3.msra.mxu1 %v3505_v6  ;;  %3065 = vmatprep.mubr.msk.f32.mxu1 %vm3421_vm1, %v3420_v1  ;;  %v1422_v6 = vadd.f32 %v3566_v18, %v1421_v32  ;;  %v4042_v32 = vld [vmem:[#allocation5 + $0x10] sm:$0xff] }
 0xbf7   :  { %3051 = vmatprep.subr.mxu1 %v3420_v1  ;;  %v1426_v38 = vpop.permute.xlu1 %1425 }
 0xbf8   :  { %3052 = vmatpush3.msra.mxu1 %v3509_v7  ;;  %v1428_v7 = vsel %vm177_vm3, %v1422_v6, %v1426_v38  ;;  %v4075_v6 = vld [vmem:[%s4366_s1 + $0x10] sm:$0xff]  ;;  %v4082_v38 = vld [vmem:[%s4366_s1 + $0x8] sm:$0xff] }
 0xbf9   :  { %3053 = vmatprep.subr.mxu1 %v3420_v1 }
 0xbfa   :  { %3054 = vmatpush3.msra.mxu1 %v3520_v9 }
 0xbfb   :  { %3055 = vmatprep.subr.mxu1 %v3420_v1 }
 0xbfc   :  { %3056 = vmatpush3.msra.mxu1 %v3534_v12 }
 0xbfd   :  { %3057 = vmatprep.subr.mxu1 %v3420_v1 }
 0xbfe   :  { %3058 = vmatpush3.msra.mxu1 %v3540_v13 }
 0xbff   :  { %3059 = vmatprep.subr.mxu1 %v3420_v1 }
 0xc00   :  { %3060 = vmatpush3.msra.mxu1 %v3545_v14 }
 0xc01   :  { %3061 = vmatprep.subr.mxu1 %v3420_v1 }
 0xc02   :  { %3062 = vmatpush3.msra.mxu1 %v3554_v15 }
 0xc03   :  { %3063 = vmatprep.subr.mxu1 %v3420_v1 }
 0xc04   :  { %3064 = vmatpush3.msra.mxu1 %v3558_v16 }
 0xc05   :  { %3066 = vmatmul.mubr.msk.f32.vlgmr.msra.gmra.mxu1 %vm185_vm4, %v1428_v7  ;;  %3087 = vmatprep.subr.mxu1 %v3420_v1  ;;  %v4089_v7 = vld [vmem:[%s4366_s1] sm:$0xff] }
 0xc06   :  { %3088 = vmatpush3.msra.mxu1 %v3491_v2  ;;  %3097 = vmatprep.mubr.msk.f32.mxu1 %vm3421_vm1, %v3420_v1 }
 0xc07   :  { %3089 = vmatprep.subr.mxu1 %v3420_v1 }
 0xc08   :  { %3090 = vmatpush3.msra.mxu1 %v3496_v3 }
 0xc09   :  { %3091 = vmatprep.subr.mxu1 %v3420_v1 }
 0xc0a   :  { %3092 = vmatpush3.msra.mxu1 %v3503_v4 }
 0xc0b   :  { %3093 = vmatprep.subr.mxu1 %v3420_v1 }
 0xc0c   :  { %3094 = vmatpush3.msra.mxu1 %v3515_v8 }
 0xc0d   :  { %3095 = vmatprep.subr.mxu1 %v3420_v1 }
 0xc0e   :  { %3096 = vmatpush3.msra.mxu1 %v3526_v10 }
 0xc0f   :  { %3119 = vmatprep.subr.mxu1 %v3420_v1  ;;  %3098 = vmatmul.mubr.msk.f32.vlgmr.msra.gmra.mxu1 %vm99_vm2, %v2625_v56  ;;  %v2630_v56 = vld [vmem:[%s4365_s0 + $0xc] sm:$0x3] }
 0xc10   :  { %3120 = vmatpush3.msra.mxu1 %v3615_v45  ;;  %3135 = vmatprep.mubr.msk.f32.mxu1 %vm3421_vm1, %v3420_v1 }
 0xc11   :  { %3121 = vmatprep.subr.mxu1 %v3420_v1 }
 0xc12   :  { %3122 = vmatpush3.msra.mxu1 %v3617_v46 }
 0xc13   :  { %3123 = vmatprep.subr.mxu1 %v3420_v1 }
 0xc14   :  { %3124 = vmatpush3.msra.mxu1 %v3622_v47 }
 0xc15   :  { %3125 = vmatprep.subr.mxu1 %v3420_v1 }
 0xc16   :  { %3126 = vmatpush3.msra.mxu1 %v3628_v48 }
 0xc17   :  { %3127 = vmatprep.subr.mxu1 %v3420_v1 }
 0xc18   :  { %3128 = vmatpush3.msra.mxu1 %v3634_v50 }
 0xc19   :  { %3129 = vmatprep.subr.mxu1 %v3420_v1 }
 0xc1a   :  { %3130 = vmatpush3.msra.mxu1 %v3640_v52 }
 0xc1b   :  { %3131 = vmatprep.subr.mxu1 %v3420_v1 }
 0xc1c   :  { %3132 = vmatpush3.msra.mxu1 %v3646_v53 }
 0xc1d   :  { %3133 = vmatprep.subr.mxu1 %v3420_v1 }
 0xc1e   :  { %3134 = vmatpush3.msra.mxu1 %v3652_v54 }
 0xc1f   :  { %3151 = vmatprep.subr.mxu1 %v3420_v1 }
 0xcb5   :  { %v1299_v2 = vpop.f32.mrf.mxu1 }
 0xcb6   :  { %v1300_v9 = vadd.f32 %v3705_v5, %v1299_v2 }
 0xcb7   :  { %v3035_v12 = vpop.f32.mrf.mxu1 }
 0xcb8   :  { %v1303_v3 = vmul.f32 %v1300_v9, %v3598_v29 }
 0xcba   :  { %3281 = vtanh.f32 %v1303_v3 }
 0xcc5   :  { %v1498_v13 = vpop.f32.mrf.mxu1 }
 0xcc6   :  { %v1499_v4 = vadd.f32 %v3594_v27, %v1498_v13 }
 0xcc7   :  { %v3282_v14 = vpop.eup %3281  ;;  %v3067_v15 = vpop.f32.mrf.mxu1 }
 0xcc8   :  { %v1502_v8 = vmul.f32 %v1499_v4, %v3598_v29  ;;  %v1305_v16 = vmul.f32 0.5, %v3282_v14  ;;  %v4098_v4 = vld [vmem:[%s4369_s4] ss:$0 sm:$0xff] }
 0xcca   :  { %3283 = vtanh.f32 %v1502_v8  ;;  %v1306_v18 = vadd.f32 0.5, %v1305_v16 }
 0xccc   :  { %v1307_v10 = vsel %vm3587_vm7, %v3282_v14, %v1306_v18 }
 0xccd   :  { %1310 = vrot.lane.b32.xlu0 %v1307_v10, %s3424_s25  ;;  %v1308_v45 = vmul.f32 %v1307_v10, %v3912_v22  ;;  %v4014_v22 = vld [vmem:[#allocation5 + $0x38] sm:$0xff] }
 0xccf   :  { %v1724_v61 = vpop.f32.mrf.mxu1 }
 0xcd0   :  { %v1725_v31 = vadd.f32 %v4039_v30, %v1724_v61 }
 0xcd1   :  { %v3099_v0 = vpop.f32.mrf.mxu1 }
 0xcd7   :  { %v3284_v39 = vpop.eup %3283 }
 0xcd8   :  { %v1504_v40 = vmul.f32 0.5, %v3284_v39 }
 0xcda   :  { %v1505_v41 = vadd.f32 0.5, %v1504_v40 }
 0xcdc   :  { %v1506_v42 = vsel %vm3587_vm7, %v3284_v39, %v1505_v41 }
 0xcdd   :  { %1509 = vrot.lane.b32.xlu1 %v1506_v42, %s3424_s25  ;;  %v1507_v48 = vmul.f32 %v1506_v42, %v3916_v28  ;;  %v4032_v28 = vld [vmem:[#allocation5 + $0x18] sm:$0xff] }
 0xd3f   :  { %v1311_v27 = vpop.permute.xlu0 %1310 }
 0xd40   :  { %v1313_v43 = vmul.f32 %v1311_v27, %v1307_v10 }
 0xd42   :  { %1315 = vrot.lane.b32.xlu0 %v1313_v43, %s3422_s14 }
 0xd4f   :  { %v1510_v49 = vpop.permute.xlu1 %1509 }
 0xd50   :  { %v1512_v51 = vmul.f32 %v1510_v49, %v1506_v42 }
 0xd52   :  { %1514 = vrot.lane.b32.xlu1 %v1512_v51, %s3422_s14 }
 0xdb4   :  { %v1316_v46 = vpop.permute.xlu0 %1315 }
 0xdb5   :  { %v3997_v47 = vadd.f32 %v1316_v46, %v1308_v45  ;;  %v4114_v45 = vld [vmem:[#allocation5 + $0x78] sm:$0xff]  ;;  %v4120_v46 = vld [vmem:[#allocation5 + $0x70] sm:$0xff] }
 0xdb7   :  { %3285 = vtanh.f32 %v3997_v47 }
 0xdc4   :  { %v3286_v50 = vpop.eup %3285  ;;  %v1515_v52 = vpop.permute.xlu1 %1514 }
 0xdc5   :  { %v4001_v57 = vadd.f32 %v1515_v52, %v1507_v48  ;;  %1321 = vrot.lane.b32.xlu0 %v3286_v50, %s3424_s25  ;;  %v4124_v48 = vld [vmem:[#allocation5 + $0x68] sm:$0xff]  ;;  %v4128_v50 = vld [vmem:[#allocation5 + $0x60] sm:$0xff]  ;;  %v4132_v52 = vld [vmem:[#allocation5 + $0x58] sm:$0xff] }
 0xdc7   :  { %3287 = vtanh.f32 %v4001_v57 }
 0xdd4   :  { %v3288_v53 = vpop.eup %3287 }
 0xdd5   :  { %1520 = vrot.lane.b32.xlu1 %v3288_v53, %s3424_s25  ;;  %v4136_v53 = vld [vmem:[#allocation5 + $0x50] sm:$0xff] }
 0xe37   :  { %v1322_v58 = vpop.permute.xlu0 %1321 }
 0xe38   :  { %v4006_v60 = vmul.f32 %v1322_v58, %v1307_v10  ;;  %v4140_v58 = vld [vmem:[#allocation5 + $0x48] sm:$0xff] }
 0xe3a   :  { %1529 = vrot.lane.b32.xlu1 %v4006_v60, %s3424_s25 }
 0xe47   :  { %v1521_v44 = vpop.permute.xlu1 %1520 }
 0xe48   :  { %v1523_v11 = vmul.f32 %v1521_v44, %v1506_v42 }
 0xe4a   :  { %1525 = vrot.lane.b32.xlu0 %v1523_v11, %s3422_s14 }
 0xe4e   :  { %1728 = vrot.lane.b32.xlu0 %v1523_v11, %s3424_s25 }
 0xeac   :  { %v1530_v19 = vpop.permute.xlu1 %1529 }
 0xebc   :  { %v1526_v20 = vpop.permute.xlu0 %1525 }
 0xebd   :  { %v1532_v21 = vsel %vm177_vm3, %v1526_v20, %v1530_v19 }
 0xebe   :  { %3085 = vmatmul.mubr.msk.f32.vlgmr.msra.gmra.mxu0 %vm185_vm4, %v1532_v21 }
 0xebf   :  { %3101 = vmatpush3.msra.mxu0 %v4014_v22  ;;  %3116 = vmatprep.mubr.msk.f32.mxu0 %vm3421_vm1, %v3420_v1 }
 0xec0   :  { %3102 = vmatprep.subr.mxu0 %v3420_v1  ;;  %v1729_v33 = vpop.permute.xlu0 %1728 }
 0xec1   :  { %3103 = vmatpush3.msra.mxu0 %v4020_v59  ;;  %v1731_v34 = vsel %vm177_vm3, %v1725_v31, %v1729_v33 }
 0xec2   :  { %3104 = vmatprep.subr.mxu0 %v3420_v1 }
 0xec3   :  { %3105 = vmatpush3.msra.mxu0 %v4024_v23 }
 0xec4   :  { %3106 = vmatprep.subr.mxu0 %v3420_v1 }
 0xec5   :  { %3107 = vmatpush3.msra.mxu0 %v4028_v24 }
 0xec6   :  { %3108 = vmatprep.subr.mxu0 %v3420_v1 }
 0xec7   :  { %3109 = vmatpush3.msra.mxu0 %v4032_v28 }
 0xec8   :  { %3110 = vmatprep.subr.mxu0 %v3420_v1 }
 0xec9   :  { %3111 = vmatpush3.msra.mxu0 %v4042_v32 }
 0xeca   :  { %3112 = vmatprep.subr.mxu0 %v3420_v1 }
 0xecb   :  { %3113 = vmatpush3.msra.mxu0 %v4046_v17 }
 0xecc   :  { %3114 = vmatprep.subr.mxu0 %v3420_v1 }
 0xecd   :  { %3115 = vmatpush3.msra.mxu0 %v4051_v35 }
 0xece   :  { %3117 = vmatmul.mubr.msk.f32.vlgmr.msra.gmra.mxu0 %vm185_vm4, %v1731_v34  ;;  %3138 = vmatprep.subr.mxu0 %v3420_v1 }
 0xecf   :  { %3139 = vmatpush3.msra.mxu0 %v4059_v36  ;;  %3148 = vmatprep.mubr.msk.f32.mxu0 %vm3421_vm1, %v3420_v1 }
 0xed0   :  { %3140 = vmatprep.subr.mxu0 %v3420_v1 }
 0xed1   :  { %3141 = vmatpush3.msra.mxu0 %v4068_v37 }
 0xed2   :  { %3142 = vmatprep.subr.mxu0 %v3420_v1 }
 0xed3   :  { %3143 = vmatpush3.msra.mxu0 %v4075_v6 }
 0xed4   :  { %3144 = vmatprep.subr.mxu0 %v3420_v1 }
 0xed5   :  { %3145 = vmatpush3.msra.mxu0 %v4082_v38 }
 0xed6   :  { %3146 = vmatprep.subr.mxu0 %v3420_v1 }
 0xed7   :  { %3147 = vmatpush3.msra.mxu0 %v4089_v7 }
 0xed8   :  { %3170 = vmatprep.subr.mxu0 %v3420_v1  ;;  %3149 = vmatmul.mubr.msk.f32.vlgmr.msra.gmra.mxu0 %vm99_vm2, %v2630_v56 }
 0xed9   :  { %3171 = vmatpush3.msra.mxu0 %v4114_v45  ;;  %3186 = vmatprep.mubr.msk.f32.mxu0 %vm3421_vm1, %v3420_v1 }
 0xeda   :  { %3172 = vmatprep.subr.mxu0 %v3420_v1 }
 0xedb   :  { %3173 = vmatpush3.msra.mxu0 %v4120_v46 }
 0xedc   :  { %3174 = vmatprep.subr.mxu0 %v3420_v1 }
 0xedd   :  { %3175 = vmatpush3.msra.mxu0 %v4124_v48 }
 0xede   :  { %3176 = vmatprep.subr.mxu0 %v3420_v1 }
 0xedf   :  { %3177 = vmatpush3.msra.mxu0 %v4128_v50 }
 0xee0   :  { %3178 = vmatprep.subr.mxu0 %v3420_v1 }
 0xee1   :  { %3179 = vmatpush3.msra.mxu0 %v4132_v52 }
 0xee2   :  { %3180 = vmatprep.subr.mxu0 %v3420_v1 }
 0xee3   :  { %3181 = vmatpush3.msra.mxu0 %v4136_v53 }
 0xee4   :  { %3182 = vmatprep.subr.mxu0 %v3420_v1 }
 0xee5   :  { %3183 = vmatpush3.msra.mxu0 %v4140_v58 }
 0xee6   :  { %3184 = vmatprep.subr.mxu0 %v3420_v1 }
 0xee7   :  { %3185 = vmatpush3.msra.mxu0 %v3652_v54 }
 0xee8   :  { %3202 = vmatprep.subr.mxu0 %v3420_v1 }
 0xf7e   :  { %v1602_v2 = vpop.f32.mrf.mxu0 }
 0xf7f   :  { %v1603_v9 = vadd.f32 %v3705_v5, %v1602_v2 }
 0xf80   :  { %v3086_v12 = vpop.f32.mrf.mxu0 }
 0xf81   :  { %v1606_v3 = vmul.f32 %v1603_v9, %v3598_v29 }
 0xf83   :  { %3289 = vtanh.f32 %v1606_v3 }
 0xf8e   :  { %v1801_v13 = vpop.f32.mrf.mxu0 }
 0xf8f   :  { %v1802_v14 = vadd.f32 %v4098_v4, %v1801_v13 }
 0xf90   :  { %v3290_v15 = vpop.eup %3289  ;;  %v3118_v8 = vpop.f32.mrf.mxu0 }
 0xf91   :  { %v1805_v16 = vmul.f32 %v1802_v14, %v3598_v29  ;;  %v1608_v18 = vmul.f32 0.5, %v3290_v15  ;;  %v4200_v8 = vld [vmem:[%s4369_s4 + $0x1] ss:$0 sm:$0xff] }
 0xf93   :  { %3291 = vtanh.f32 %v1805_v16  ;;  %v1609_v10 = vadd.f32 0.5, %v1608_v18 }
 0xf95   :  { %v1610_v5 = vsel %vm3587_vm7, %v3290_v15, %v1609_v10 }
 0xf96   :  { %1613 = vrot.lane.b32.xlu1 %v1610_v5, %s3424_s25  ;;  %v1611_v61 = vmul.f32 %v1610_v5, %v3997_v47 }
 0xf98   :  { %v2027_v33 = vpop.f32.mrf.mxu0 }
 0xf99   :  { %v2028_v13 = vadd.f32 %v4039_v30, %v2027_v33 }
 0xf9a   :  { %v3150_v34 = vpop.f32.mrf.mxu0 }
 0xfa0   :  { %v3292_v39 = vpop.eup %3291 }
 0xfa1   :  { %v1807_v40 = vmul.f32 0.5, %v3292_v39 }
 0xfa3   :  { %v1808_v41 = vadd.f32 0.5, %v1807_v40 }
 0xfa5   :  { %v1809_v42 = vsel %vm3587_vm7, %v3292_v39, %v1808_v41 }
 0xfa6   :  { %1812 = vrot.lane.b32.xlu0 %v1809_v42, %s3424_s25  ;;  %v1810_v11 = vmul.f32 %v1809_v42, %v4001_v57 }
0x1008   :  { %v1614_v27 = vpop.permute.xlu1 %1613 }
0x1009   :  { %v1616_v43 = vmul.f32 %v1614_v27, %v1610_v5 }
0x100b   :  { %1618 = vrot.lane.b32.xlu1 %v1616_v43, %s3422_s14 }
0x1018   :  { %v1813_v49 = vpop.permute.xlu0 %1812 }
0x1019   :  { %v1815_v51 = vmul.f32 %v1813_v49, %v1809_v42 }
0x101b   :  { %1817 = vrot.lane.b32.xlu0 %v1815_v51, %s3422_s14 }
0x107d   :  { %v1619_v0 = vpop.permute.xlu1 %1618 }
0x107e   :  { %v4147_v44 = vadd.f32 %v1619_v0, %v1611_v61 }
0x1080   :  { %3293 = vtanh.f32 %v4147_v44 }
0x108d   :  { %v3294_v19 = vpop.eup %3293  ;;  %v1818_v20 = vpop.permute.xlu0 %1817 }
0x108e   :  { %v4151_v21 = vadd.f32 %v1818_v20, %v1810_v11  ;;  %1624 = vrot.lane.b32.xlu1 %v3294_v19, %s3424_s25  ;;  %v2635_v11 = vld [vmem:[%s4365_s0 + $0xe] sm:$0x3] }
0x1090   :  { %3295 = vtanh.f32 %v4151_v21 }
0x109d   :  { %v3296_v54 = vpop.eup %3295 }
0x109e   :  { %1823 = vrot.lane.b32.xlu0 %v3296_v54, %s3424_s25 }
0x1100   :  { %v1625_v31 = vpop.permute.xlu1 %1624 }
0x1101   :  { %v4156_v47 = vmul.f32 %v1625_v31, %v1610_v5 }
0x1103   :  { %1832 = vrot.lane.b32.xlu0 %v4156_v47, %s3424_s25 }
0x1110   :  { %v1824_v57 = vpop.permute.xlu0 %1823 }
0x1111   :  { %v1826_v2 = vmul.f32 %v1824_v57, %v1809_v42 }
0x1113   :  { %1828 = vrot.lane.b32.xlu1 %v1826_v2, %s3422_s14 }
0x1117   :  { %2031 = vrot.lane.b32.xlu1 %v1826_v2, %s3424_s25 }
0x1175   :  { %v1833_v9 = vpop.permute.xlu0 %1832 }
0x1185   :  { %v1829_v12 = vpop.permute.xlu1 %1828 }
0x1186   :  { %v1835_v3 = vsel %vm177_vm3, %v1829_v12, %v1833_v9 }
0x1187   :  { %3136 = vmatmul.mubr.msk.f32.vlgmr.msra.gmra.mxu1 %vm185_vm4, %v1835_v3 }
0x1188   :  { %3152 = vmatpush3.msra.mxu1 %v4014_v22  ;;  %3167 = vmatprep.mubr.msk.f32.mxu1 %vm3421_vm1, %v3420_v1 }
0x1189   :  { %3153 = vmatprep.subr.mxu1 %v3420_v1  ;;  %v2032_v14 = vpop.permute.xlu1 %2031 }
0x118a   :  { %3154 = vmatpush3.msra.mxu1 %v4020_v59  ;;  %v2034_v15 = vsel %vm177_vm3, %v2028_v13, %v2032_v14 }
0x118b   :  { %3155 = vmatprep.subr.mxu1 %v3420_v1 }
0x118c   :  { %3156 = vmatpush3.msra.mxu1 %v4024_v23 }
0x118d   :  { %3157 = vmatprep.subr.mxu1 %v3420_v1 }
0x118e   :  { %3158 = vmatpush3.msra.mxu1 %v4028_v24 }
0x118f   :  { %3159 = vmatprep.subr.mxu1 %v3420_v1 }
0x1190   :  { %3160 = vmatpush3.msra.mxu1 %v4032_v28 }
0x1191   :  { %3161 = vmatprep.subr.mxu1 %v3420_v1 }
0x1192   :  { %3162 = vmatpush3.msra.mxu1 %v4042_v32 }
0x1193   :  { %3163 = vmatprep.subr.mxu1 %v3420_v1 }
0x1194   :  { %3164 = vmatpush3.msra.mxu1 %v4046_v17 }
0x1195   :  { %3165 = vmatprep.subr.mxu1 %v3420_v1 }
0x1196   :  { %3166 = vmatpush3.msra.mxu1 %v4051_v35 }
0x1197   :  { %3168 = vmatmul.mubr.msk.f32.vlgmr.msra.gmra.mxu1 %vm185_vm4, %v2034_v15  ;;  %3189 = vmatprep.subr.mxu1 %v3420_v1 }
0x1198   :  { %3190 = vmatpush3.msra.mxu1 %v4059_v36  ;;  %3199 = vmatprep.mubr.msk.f32.mxu1 %vm3421_vm1, %v3420_v1 }
0x1199   :  { %3191 = vmatprep.subr.mxu1 %v3420_v1 }
0x119a   :  { %3192 = vmatpush3.msra.mxu1 %v4068_v37 }
0x119b   :  { %3193 = vmatprep.subr.mxu1 %v3420_v1 }
0x119c   :  { %3194 = vmatpush3.msra.mxu1 %v4075_v6 }
0x119d   :  { %3195 = vmatprep.subr.mxu1 %v3420_v1 }
0x119e   :  { %3196 = vmatpush3.msra.mxu1 %v4082_v38 }
0x119f   :  { %3197 = vmatprep.subr.mxu1 %v3420_v1 }
0x11a0   :  { %3198 = vmatpush3.msra.mxu1 %v4089_v7 }
0x11a1   :  { %3221 = vmatprep.subr.mxu1 %v3420_v1  ;;  %3200 = vmatmul.mubr.msk.f32.vlgmr.msra.gmra.mxu1 %vm99_vm2, %v2635_v11 }
0x11a2   :  { %3222 = vmatpush3.msra.mxu1 %v4114_v45  ;;  %3237 = vmatprep.mubr.msk.f32.mxu1 %vm3421_vm1, %v3420_v1  ;;  %v3372_v45 = vld [vmem:[#allocation5 + $0x40] sm:$0xff] }
0x11a3   :  { %3223 = vmatprep.subr.mxu1 %v3420_v1 }
0x11a4   :  { %3224 = vmatpush3.msra.mxu1 %v4120_v46 }
0x11a5   :  { %3225 = vmatprep.subr.mxu1 %v3420_v1 }
0x11a6   :  { %3226 = vmatpush3.msra.mxu1 %v4124_v48 }
0x11a7   :  { %3227 = vmatprep.subr.mxu1 %v3420_v1 }
0x11a8   :  { %3228 = vmatpush3.msra.mxu1 %v4128_v50 }
0x11a9   :  { %3229 = vmatprep.subr.mxu1 %v3420_v1 }
0x11aa   :  { %3230 = vmatpush3.msra.mxu1 %v4132_v52 }
0x11ab   :  { %3231 = vmatprep.subr.mxu1 %v3420_v1 }
0x11ac   :  { %3232 = vmatpush3.msra.mxu1 %v4136_v53 }
0x11ad   :  { %3233 = vmatprep.subr.mxu1 %v3420_v1 }
0x11ae   :  { %3234 = vmatpush3.msra.mxu1 %v4140_v58 }
0x11af   :  { %3235 = vmatprep.subr.mxu1 %v3420_v1 }
0x11b0   :  { %3236 = vmatpush3.msra.mxu1 %v3372_v45 }
0x1247   :  { %v1905_v36 = vpop.f32.mrf.mxu1 }
0x1248   :  { %v1906_v37 = vadd.f32 %v4200_v8, %v1905_v36 }
0x1249   :  { %v3137_v16 = vpop.f32.mrf.mxu1 }
0x124a   :  { %v1909_v6 = vmul.f32 %v1906_v37, %v3598_v29 }
0x124c   :  { %3297 = vtanh.f32 %v1909_v6 }
0x1257   :  { %v2104_v18 = vpop.f32.mrf.mxu1 }
0x1258   :  { %v2105_v38 = vadd.f32 %v4098_v4, %v2104_v18 }
0x1259   :  { %v3298_v10 = vpop.eup %3297  ;;  %v3169_v5 = vpop.f32.mrf.mxu1 }
0x125a   :  { %v2108_v7 = vmul.f32 %v2105_v38, %v3598_v29  ;;  %v1911_v39 = vmul.f32 0.5, %v3298_v10 }
0x125c   :  { %3299 = vtanh.f32 %v2108_v7  ;;  %v1912_v40 = vadd.f32 0.5, %v1911_v39 }
0x125e   :  { %v1913_v41 = vsel %vm3587_vm7, %v3298_v10, %v1912_v40 }
0x125f   :  { %1916 = vrot.lane.b32.xlu0 %v1913_v41, %s3424_s25  ;;  %v1914_v46 = vmul.f32 %v1913_v41, %v4147_v44 }
0x1261   :  { %v2330_v31 = vpop.f32.mrf.mxu1 }
0x1263   :  { %v3201_v33 = vpop.f32.mrf.mxu1 }
0x1269   :  { %v3300_v42 = vpop.eup %3299 }
0x126a   :  { %v2110_v27 = vmul.f32 0.5, %v3300_v42 }
0x126c   :  { %v2111_v43 = vadd.f32 0.5, %v2110_v27 }
0x126e   :  { %v2112_v49 = vsel %vm3587_vm7, %v3300_v42, %v2111_v43 }
0x126f   :  { %2115 = vrot.lane.b32.xlu1 %v2112_v49, %s3424_s25  ;;  %v2113_v52 = vmul.f32 %v2112_v49, %v4151_v21 }
0x12d1   :  { %v1917_v51 = vpop.permute.xlu0 %1916 }
0x12d2   :  { %v1919_v56 = vmul.f32 %v1917_v51, %v1913_v41 }
0x12d4   :  { %1921 = vrot.lane.b32.xlu0 %v1919_v56, %s3422_s14 }
0x12e1   :  { %v2116_v61 = vpop.permute.xlu1 %2115 }
0x12e2   :  { %v2118_v0 = vmul.f32 %v2116_v61, %v2112_v49 }
0x12e4   :  { %2120 = vrot.lane.b32.xlu1 %v2118_v0, %s3422_s14 }
0x1346   :  { %v1922_v48 = vpop.permute.xlu0 %1921 }
0x1347   :  { %v4235_v50 = vadd.f32 %v1922_v48, %v1914_v46 }
0x1349   :  { %3301 = vtanh.f32 %v4235_v50 }
0x1356   :  { %v3302_v19 = vpop.eup %3301  ;;  %v2121_v20 = vpop.permute.xlu1 %2120 }
0x1357   :  { %v4239_v53 = vadd.f32 %v2121_v20, %v2113_v52  ;;  %1927 = vrot.lane.b32.xlu0 %v3302_v19, %s3424_s25 }
0x1359   :  { %3303 = vtanh.f32 %v4239_v53 }
0x1366   :  { %v3304_v58 = vpop.eup %3303 }
0x1367   :  { %2126 = vrot.lane.b32.xlu1 %v3304_v58, %s3424_s25 }
0x13c9   :  { %v1928_v54 = vpop.permute.xlu0 %1927 }
0x13ca   :  { %v4244_v44 = vmul.f32 %v1928_v54, %v1913_v41  ;;  %v2602_v54 = vld [vmem:[%s4370_s5] ss:$0 sm:$0xff]  ;;  %s3427_s5 = smov [#allocation8]  }
0x13cc   :  { %2135 = vrot.lane.b32.xlu1 %v4244_v44, %s3424_s25 }
0x13d9   :  { %v2127_v21 = vpop.permute.xlu1 %2126 }
0x13da   :  { %v2129_v34 = vmul.f32 %v2127_v21, %v2112_v49 }
0x13dc   :  { %2131 = vrot.lane.b32.xlu0 %v2129_v34, %s3422_s14 }
0x13e0   :  { %2334 = vrot.lane.b32.xlu0 %v2129_v34, %s3424_s25 }
0x143e   :  { %v2136_v57 = vpop.permute.xlu1 %2135 }
0x144e   :  { %v2132_v2 = vpop.permute.xlu0 %2131 }
0x144f   :  { %v2138_v9 = vsel %vm177_vm3, %v2132_v2, %v2136_v57 }
0x1450   :  { %3187 = vmatmul.mubr.msk.f32.vlgmr.msra.gmra.mxu0 %vm185_vm4, %v2138_v9 }
0x1451   :  { %3203 = vmatpush3.msra.mxu0 %v4014_v22  ;;  %3218 = vmatprep.mubr.msk.f32.mxu0 %vm3421_vm1, %v3420_v1  ;;  %v2331_v22 = vadd.f32 %v4039_v30, %v2330_v31  ;;  %vm2562_vm1 = vcmask 58368  }
0x1452   :  { %3204 = vmatprep.subr.mxu0 %v3420_v1  ;;  %v2335_v12 = vpop.permute.xlu0 %2334 }
0x1453   :  { %3205 = vmatpush3.msra.mxu0 %v4020_v59  ;;  %v2337_v59 = vsel %vm177_vm3, %v2331_v22, %v2335_v12 }
0x1454   :  { %3206 = vmatprep.subr.mxu0 %v3420_v1 }
0x1455   :  { %3207 = vmatpush3.msra.mxu0 %v4024_v23 }
0x1456   :  { %3208 = vmatprep.subr.mxu0 %v3420_v1 }
0x1457   :  { %3209 = vmatpush3.msra.mxu0 %v4028_v24 }
0x1458   :  { %3210 = vmatprep.subr.mxu0 %v3420_v1 }
0x1459   :  { %3211 = vmatpush3.msra.mxu0 %v4032_v28 }
0x145a   :  { %3212 = vmatprep.subr.mxu0 %v3420_v1 }
0x145b   :  { %3213 = vmatpush3.msra.mxu0 %v4042_v32 }
0x145c   :  { %3214 = vmatprep.subr.mxu0 %v3420_v1 }
0x145d   :  { %3215 = vmatpush3.msra.mxu0 %v4046_v17 }
0x145e   :  { %3216 = vmatprep.subr.mxu0 %v3420_v1 }
0x145f   :  { %3217 = vmatpush3.msra.mxu0 %v4051_v35 }
0x1460   :  { %3219 = vmatmul.mubr.msk.f32.vlgmr.msra.gmra.mxu0 %vm185_vm4, %v2337_v59 }
0x1510   :  { %v2208_v23 = vpop.f32.mrf.mxu0 }
0x1511   :  { %v2209_v24 = vadd.f32 %v4200_v8, %v2208_v23 }
0x1512   :  { %v3188_v28 = vpop.f32.mrf.mxu0 }
0x1513   :  { %v2212_v30 = vmul.f32 %v2209_v24, %v3598_v29  ;;  %v3426_v28 = vmov 0  }
0x1514   :  { %3251 = vset.pattern.permute.xlu1 %v3426_v28  ;;  %3252 = vset.pattern.permute.xlu0 %v3426_v28 }
0x1515   :  { %3305 = vtanh.f32 %v2212_v30 }
0x1520   :  { %v2407_v32 = vpop.f32.mrf.mxu0 }
0x1521   :  { %v2408_v3 = vadd.f32 %v4098_v4, %v2407_v32 }
0x1522   :  { %v3306_v13 = vpop.eup %3305  ;;  %v3220_v17 = vpop.f32.mrf.mxu0 }
0x1523   :  { %v2411_v1 = vmul.f32 %v2408_v3, %v3598_v29  ;;  %v2214_v14 = vmul.f32 0.5, %v3306_v13 }
0x1525   :  { %3307 = vtanh.f32 %v2411_v1  ;;  %v2215_v15 = vadd.f32 0.5, %v2214_v14 }
0x1527   :  { %v2216_v35 = vsel %vm3587_vm7, %v3306_v13, %v2215_v15 }
0x1528   :  { %2219 = vrot.lane.b32.xlu1 %v2216_v35, %s3424_s25  ;;  %v2217_v5 = vmul.f32 %v2216_v35, %v4235_v50 }
0x1532   :  { %v3308_v36 = vpop.eup %3307 }
0x1533   :  { %v2413_v37 = vmul.f32 0.5, %v3308_v36 }
0x1535   :  { %v2414_v16 = vadd.f32 0.5, %v2413_v37 }
0x1537   :  { %v2415_v6 = vsel %vm3587_vm7, %v3308_v36, %v2414_v16 }
0x1538   :  { %2418 = vrot.lane.b32.xlu0 %v2415_v6, %s3424_s25  ;;  %v2416_v40 = vmul.f32 %v2415_v6, %v4239_v53 }
0x159a   :  { %v2220_v4 = vpop.permute.xlu1 %2219 }
0x159b   :  { %v2222_v18 = vmul.f32 %v2220_v4, %v2216_v35 }
0x159d   :  { %2224 = vrot.lane.b32.xlu1 %v2222_v18, %s3422_s14 }
0x15aa   :  { %v2419_v38 = vpop.permute.xlu0 %2418 }
0x15ab   :  { %v2421_v10 = vmul.f32 %v2419_v38, %v2415_v6 }
0x15ad   :  { %2423 = vrot.lane.b32.xlu0 %v2421_v10, %s3422_s14 }
0x160f   :  { %v2225_v7 = vpop.permute.xlu1 %2224 }
0x1610   :  { %v2227_v39 = vadd.f32 %v2225_v7, %v2217_v5 }
0x1612   :  { %3309 = vtanh.f32 %v2227_v39 }
0x161f   :  { %v3310_v41 = vpop.eup %3309  ;;  %v2424_v42 = vpop.permute.xlu0 %2423 }
0x1620   :  { %v4286_v27 = vadd.f32 %v2424_v42, %v2416_v40  ;;  %2230 = vrot.lane.b32.xlu1 %v3310_v41, %s3424_s25 }
0x1622   :  { %3311 = vtanh.f32 %v4286_v27 }
0x162f   :  { %v3312_v43 = vpop.eup %3311 }
0x1630   :  { %2429 = vrot.lane.b32.xlu0 %v3312_v43, %s3424_s25 }
0x1692   :  { %v2231_v49 = vpop.permute.xlu1 %2230 }
0x1693   :  { %v2233_v51 = vmul.f32 %v2231_v49, %v2216_v35 }
0x1695   :  { %2438 = vrot.lane.b32.xlu0 %v2233_v51, %s3424_s25 }
0x16a2   :  { %v2430_v56 = vpop.permute.xlu0 %2429 }
0x16a3   :  { %v2432_v61 = vmul.f32 %v2430_v56, %v2415_v6 }
0x16a5   :  { %2434 = vrot.lane.b32.xlu1 %v2432_v61, %s3422_s14 }
0x1707   :  { %v2439_v0 = vpop.permute.xlu0 %2438 }
0x1717   :  { %v2435_v11 = vpop.permute.xlu1 %2434 }
0x1718   :  { %v2441_v45 = vsel %vm177_vm3, %v2435_v11, %v2439_v0  ;;  %2564 = vst.msk [vmem:[#allocation2] sm:$0x3] %vm47_vm0, %v2435_v11 }
0x1719   :  { %3238 = vmatmul.mubr.msk.f32.vlgmr.msra.gmra.mxu1 %vm185_vm4, %v2441_v45 }
0x17d9   :  { %v2511_v46 = vpop.f32.mrf.mxu1 }
0x17da   :  { %v2512_v48 = vadd.f32 %v4200_v8, %v2511_v46 }
0x17db   :  { %v3239_v50 = vpop.f32.mrf.mxu1 }
0x17dc   :  { %v2515_v52 = vmul.f32 %v2512_v48, %v3598_v29 }
0x17de   :  { %3313 = vtanh.f32 %v2515_v52 }
0x17eb   :  { %v3314_v19 = vpop.eup %3313 }
0x17ec   :  { %v2517_v20 = vmul.f32 0.5, %v3314_v19 }
0x17ee   :  { %v2518_v53 = vadd.f32 0.5, %v2517_v20 }
0x17f0   :  { %v2519_v58 = vsel %vm3587_vm7, %v3314_v19, %v2518_v53 }
0x17f1   :  { %2522 = vrot.lane.b32.xlu1 %v2519_v58, %s3424_s25  ;;  %v2520_v21 = vmul.f32 %v2519_v58, %v2227_v39 }
0x17f5   :  { %406 = vrot.lane.b32.xlu1 %v2602_v54, %s3425_s3 }
0x1863   :  { %v2523_v8 = vpop.permute.xlu1 %2522 }
0x1864   :  { %v2525_v31 = vmul.f32 %v2523_v8, %v2519_v58 }
0x1866   :  { %2527 = vrot.lane.b32.xlu0 %v2525_v31, %s3422_s14 }
0x1867   :  { %v407_v29 = vpop.permute.xlu1 %406 }
0x1868   :  { %v409_v33 = vmul.f32 %v407_v29, %v3751_v62  ;;  %v719_v26 = vmul.f32 %v3836_v55, %v407_v29  ;;  %v1022_v55 = vmul.f32 %v3921_v63, %v407_v29  ;;  %v1325_v59 = vmul.f32 %v4006_v60, %v407_v29 }
0x1869   :  { %v1628_v23 = vmul.f32 %v4156_v47, %v407_v29  ;;  %v1931_v24 = vmul.f32 %v4244_v44, %v407_v29  ;;  %v2234_v30 = vmul.f32 %v2233_v51, %v407_v29  ;;  %v4329_v47 = vld [vmem:[#allocation4] ss:$0 sm:$0xff] }
0x186a   :  { %411 = vrot.lane.b32.xlu0 %v409_v33, %s3422_s14 }
0x186e   :  { %721 = vrot.lane.b32.xlu0 %v719_v26, %s3422_s14 }
0x18d8   :  { %v2528_v34 = vpop.permute.xlu0 %2527 }
0x18d9   :  { %v4310_v57 = vadd.f32 %v2528_v34, %v2520_v21 }
0x18db   :  { %3315 = vtanh.f32 %v4310_v57 }
0x18dc   :  { %v412_v2 = vpop.permute.xlu0 %411 }
0x18dd   :  { %v415_v9 = vsel %vm47_vm0, %v412_v2, 0.0 }
0x18de   :  { %416 = vadd.xlane.f32.xlu1 %v415_v9 }
0x18e0   :  { %v722_v62 = vpop.permute.xlu0 %721 }
0x18e1   :  { %v724_v12 = vsel %vm47_vm0, %v722_v62, 0.0 }
0x18e8   :  { %v3316_v22 = vpop.eup %3315 }
0x18e9   :  { %2533 = vrot.lane.b32.xlu0 %v3316_v22, %s3424_s25 }
0x1908   :  { %725 = vadd.xlane.f32.xlu0 %v724_v12 }
0x191e   :  { %1024 = vrot.lane.b32.xlu0 %v1022_v55, %s3422_s14 }
0x1922   :  { %1327 = vrot.lane.b32.xlu0 %v1325_v59, %s3422_s14 }
0x1926   :  { %1630 = vrot.lane.b32.xlu0 %v1628_v23, %s3422_s14 }
0x192a   :  { %1933 = vrot.lane.b32.xlu0 %v1931_v24, %s3422_s14 }
0x192e   :  { %2236 = vrot.lane.b32.xlu0 %v2234_v30, %s3422_s14 }
0x195b   :  { %v2534_v63 = vpop.permute.xlu0 %2533 }
0x195c   :  { %v4325_v32 = vmul.f32 %v2534_v63, %v2519_v58 }
0x195e   :  { %v2537_v60 = vmul.f32 %v4325_v32, %v407_v29 }
0x1960   :  { %2539 = vrot.lane.b32.xlu0 %v2537_v60, %s3422_s14 }
0x1967   :  { %v417_v5 = vpop.xlane.xlu1 %416 }
0x1968   :  { %v424_v7 = vadd.f32 %v4329_v47, %v417_v5 }
0x196a   :  { %v2604_v39 = vmul.f32 -1.442695, %v424_v7 }
0x1991   :  { %v726_v3 = vpop.xlane.xlu0 %725 }
0x1992   :  { %v727_v44 = vadd.f32 %v4329_v47, %v726_v3 }
0x1994   :  { %v2609_v13 = vmul.f32 -1.442695, %v727_v44 }
0x1995   :  { %v1025_v17 = vpop.permute.xlu0 %1024 }
0x1996   :  { %3317 = vpow2.f32 %v2609_v13  ;;  %v1027_v1 = vsel %vm47_vm0, %v1025_v17, 0.0 }
0x1997   :  { %1028 = vadd.xlane.f32.xlu1 %v1027_v1 }
0x1999   :  { %v1328_v14 = vpop.permute.xlu0 %1327 }
0x199a   :  { %v1330_v15 = vsel %vm47_vm0, %v1328_v14, 0.0 }
0x199b   :  { %1331 = vadd.xlane.f32.xlu0 %v1330_v15 }
0x199d   :  { %v1631_v35 = vpop.permute.xlu0 %1630 }
0x199e   :  { %v1633_v36 = vsel %vm47_vm0, %v1631_v35, 0.0 }
0x199f   :  { %1634 = vadd.xlane.f32.xlu1 %v1633_v36 }
0x19a1   :  { %v1934_v37 = vpop.permute.xlu0 %1933 }
0x19a2   :  { %v1936_v16 = vsel %vm47_vm0, %v1934_v37, 0.0 }
0x19a3   :  { %v3318_v6 = vpop.eup %3317  ;;  %1937 = vadd.xlane.f32.xlu0 %v1936_v16 }
0x19a4   :  { %v731_v4 = vadd.f32 1.0, %v3318_v6 }
0x19a5   :  { %v2237_v18 = vpop.permute.xlu0 %2236 }
0x19a6   :  { %3319 = vrcp.f32 %v731_v4  ;;  %v2239_v38 = vsel %vm47_vm0, %v2237_v18, 0.0 }
0x19a7   :  { %2240 = vadd.xlane.f32.xlu0 %v2239_v38  ;;  %3321 = vpow2.f32 %v2604_v39 }
0x19b3   :  { %v3320_v10 = vpop.eup %3319 }
0x19b4   :  { %739 = vperm.xlu1 %3251, %v3320_v10   ;;  %v3322_v42 = vpop.eup %3321 }
0x19b5   :  { %v428_v43 = vadd.f32 1.0, %v3322_v42 }
0x19b7   :  { %3323 = vrcp.f32 %v428_v43 }
0x19c4   :  { %v3324_v49 = vpop.eup %3323 }
0x19d2   :  { %v2540_v40 = vpop.permute.xlu0 %2539 }
0x19d3   :  { %v2542_v41 = vsel %vm47_vm0, %v2540_v40, 0.0 }
0x19d4   :  { %2543 = vadd.xlane.f32.xlu0 %v2542_v41 }
0x19ea   :  { %436 = vperm.xlu0 %3252, %v3324_v49  }
0x1a20   :  { %v1029_v51 = vpop.xlane.xlu1 %1028 }
0x1a21   :  { %v1030_v56 = vadd.f32 %v4329_v47, %v1029_v51 }
0x1a23   :  { %v2614_v61 = vmul.f32 -1.442695, %v1030_v56 }
0x1a24   :  { %v1332_v0 = vpop.xlane.xlu0 %1331 }
0x1a25   :  { %3325 = vpow2.f32 %v2614_v61  ;;  %v1333_v11 = vadd.f32 %v4329_v47, %v1332_v0 }
0x1a27   :  { %v2619_v45 = vmul.f32 -1.442695, %v1333_v11 }
0x1a28   :  { %v1635_v46 = vpop.xlane.xlu1 %1634 }
0x1a29   :  { %3327 = vpow2.f32 %v2619_v45  ;;  %v1636_v48 = vadd.f32 %v4329_v47, %v1635_v46 }
0x1a2b   :  { %v2624_v50 = vmul.f32 -1.442695, %v1636_v48 }
0x1a2c   :  { %v1938_v52 = vpop.xlane.xlu0 %1937 }
0x1a2d   :  { %3329 = vpow2.f32 %v2624_v50  ;;  %v1939_v19 = vadd.f32 %v4329_v47, %v1938_v52 }
0x1a2f   :  { %v2629_v20 = vmul.f32 -1.442695, %v1939_v19  ;;  %v740_v44 = vpop.permute.xlu1 %739 }
0x1a30   :  { %v2241_v53 = vpop.xlane.xlu0 %2240 }
0x1a31   :  { %3331 = vpow2.f32 %v2629_v20  ;;  %v2242_v58 = vadd.f32 %v4329_v47, %v2241_v53 }
0x1a32   :  { %v3326_v54 = vpop.eup %3325 }
0x1a33   :  { %v1034_v8 = vadd.f32 1.0, %v3326_v54  ;;  %v2634_v31 = vmul.f32 -1.442695, %v2242_v58 }
0x1a35   :  { %3333 = vrcp.f32 %v1034_v8 }
0x1a36   :  { %v3328_v29 = vpop.eup %3327  ;;  %3335 = vpow2.f32 %v2634_v31 }
0x1a37   :  { %v1337_v33 = vadd.f32 1.0, %v3328_v29 }
0x1a39   :  { %3337 = vrcp.f32 %v1337_v33 }
0x1a3a   :  { %v3330_v26 = vpop.eup %3329 }
0x1a3b   :  { %v1640_v21 = vadd.f32 1.0, %v3330_v26 }
0x1a3d   :  { %3339 = vrcp.f32 %v1640_v21 }
0x1a3e   :  { %v3332_v34 = vpop.eup %3331 }
0x1a3f   :  { %v1943_v2 = vadd.f32 1.0, %v3332_v34 }
0x1a41   :  { %3341 = vrcp.f32 %v1943_v2 }
0x1a42   :  { %v3334_v9 = vpop.eup %3333 }
0x1a43   :  { %v3336_v22 = vpop.eup %3335  ;;  %1042 = vperm.xlu1 %3251, %v3334_v9  }
0x1a44   :  { %v2246_v62 = vadd.f32 1.0, %v3336_v22 }
0x1a46   :  { %v3338_v12 = vpop.eup %3337  ;;  %3343 = vrcp.f32 %v2246_v62 }
0x1a47   :  { %1345 = vperm.xlu1 %3251, %v3338_v12  }
0x1a4a   :  { %v3340_v55 = vpop.eup %3339 }
0x1a4b   :  { %1648 = vperm.xlu0 %3252, %v3340_v55  }
0x1a4e   :  { %v3342_v59 = vpop.eup %3341 }
0x1a4f   :  { %1951 = vperm.xlu1 %3251, %v3342_v59  }
0x1a53   :  { %v3344_v23 = vpop.eup %3343  ;;  %2566 = vrot.lane.b32.xlu1 %v4286_v27, %s3425_s3 }
0x1a54   :  { %2254 = vperm.xlu0 %3252, %v3344_v23  }
0x1a57   :  { %2576 = vrot.lane.b32.xlu1 %v4310_v57, %s3425_s3 }
0x1a5d   :  { %v2544_v24 = vpop.xlane.xlu0 %2543 }
0x1a5e   :  { %v2545_v28 = vadd.f32 %v4329_v47, %v2544_v24 }
0x1a60   :  { %v2639_v30 = vmul.f32 -1.442695, %v2545_v28 }
0x1a62   :  { %3345 = vpow2.f32 %v2639_v30 }
0x1a65   :  { %v437_v47 = vpop.permute.xlu0 %436 }
0x1a66   :  { %v439_v14 = vsel %vm431_vm8, %v437_v47, 0.0 }
0x1a6f   :  { %v3346_v63 = vpop.eup %3345 }
0x1a70   :  { %v2549_v60 = vadd.f32 1.0, %v3346_v63 }
0x1a72   :  { %3347 = vrcp.f32 %v2549_v60 }
0x1a7f   :  { %v3348_v3 = vpop.eup %3347 }
0x1a80   :  { %2557 = vperm.xlu0 %3252, %v3348_v3  }
0x1a84   :  { %2571 = vrot.lane.b32.xlu0 %v4325_v32, %s3422_s14  ;;  %v742_v32 = vsel %vm734_vm9, %v740_v44, 0.0  ;;  %s2586_s14 = sshll.u32 %s3427_s5, 4  ;;  %s2587_s14 = int_to_ptr.vmem [resolvable:$true] %s2586_s14 }
0x1a85   :  { %v743_v35 = vadd.f32 %v742_v32, %v439_v14  ;;  %s3393_s25 = scalar_lea.vmem %s2587_s14, 32  ;;  %p3398_p6 = scmp.lt.s32.totalorder %s2587_s14, %s2587_s14 }
0x1a86   :  { %p3394_p5 = scmp.ne.s32.totalorder %s2587_s14, %s3393_s25  ;;  %p3399_p7 = scmp.lt.s32.totalorder %s3393_s25, %s3393_s25 }
0x1a88   :  { %p3400_p8 = por %p3399_p7, %p3398_p6 }
0x1a8a   :  { %p3401_p9 = pnand %p3400_p8, %p3394_p5 }
0x1abe   :  { %v1043_v13 = vpop.permute.xlu1 %1042 }
0x1abf   :  { %v1045_v15 = vsel %vm1037_vm10, %v1043_v13, 0.0 }
0x1ac0   :  { %v1046_v16 = vadd.f32 %v1045_v15, %v743_v35 }
0x1ac2   :  { %v1346_v27 = vpop.permute.xlu1 %1345 }
0x1ac3   :  { %v1348_v37 = vsel %vm1340_vm11, %v1346_v27, 0.0 }
0x1ac4   :  { %v1349_v4 = vadd.f32 %v1348_v37, %v1046_v16 }
0x1ac6   :  { %v1649_v36 = vpop.permute.xlu0 %1648 }
0x1ac7   :  { %v1651_v6 = vsel %vm1643_vm12, %v1649_v36, 0.0 }
0x1ac8   :  { %v1652_v10 = vadd.f32 %v1651_v6, %v1349_v4 }
0x1aca   :  { %v1952_v17 = vpop.permute.xlu1 %1951 }
0x1acb   :  { %v1954_v38 = vsel %vm1946_vm13, %v1952_v17, 0.0 }
0x1acc   :  { %v1955_v7 = vadd.f32 %v1954_v38, %v1652_v10 }
0x1ace   :  { %v2567_v1 = vpop.permute.xlu1 %2566 }
0x1acf   :  { %2569 = vst.msk [vmem:[#allocation3] sm:$0x3] %vm47_vm0, %v2567_v1  ;;  %v2255_v18 = vpop.permute.xlu0 %2254 }
0x1ad0   :  { %v2257_v5 = vsel %vm2249_vm14, %v2255_v18, 0.0 }
0x1ad1   :  { %v2258_v39 = vadd.f32 %v2257_v5, %v1955_v7 }
0x1ad2   :  { %v2577_v57 = vpop.permute.xlu1 %2576 }
0x1ad3   :  { %2579 = vst.msk [vmem:[#allocation3 + $0x2] sm:$0x3] %vm47_vm0, %v2577_v57 }
0x1afb   :  { %v2558_v40 = vpop.permute.xlu0 %2557 }
0x1afc   :  { %v2560_v41 = vsel %vm2552_vm15, %v2558_v40, 0.0 }
0x1afd   :  { %v2561_v42 = vadd.f32 %v2560_v41, %v2258_v39 }
0x1aff   :  { %v2572_v43 = vpop.permute.xlu0 %2571  ;;  %2563 = vst.msk [vmem:[#allocation8] sm:$0x3] %vm2562_vm1, %v2561_v42 }
0x1b00   :  { %2574 = vst.msk [vmem:[#allocation2 + $0x2] sm:$0x3] %vm47_vm0, %v2572_v43 }
0x1b01   :  { %3404 = shalt.err (!%p3401_p9)
}
0x1b02   :  { %2589 = dma.vmem_to_hbm [thread:$0]  %s2587_s14, 32, %s4372_s7, [#allocation7]  }
0x1b03   :  { %3415 = dma.done.wait [#allocation7], 32  }
0x1b04   :  { %3416 = vsyncadd [#allocation7], 4294967264 }
0x1b05   :  { %2593 = vsyncpa [#allocation6], 1 }
0x1b06   :  { %2594 = vsyncpa [#allocation7], 1 }

</bundles_post_ra>
